<compile_context>
chip_gen: v7x
topology: tpu7x:2x2x1
jax: 0.10.0
libtpu: 0.0.40
codegen_flags: <defaults>
</compile_context>

<pallas_src>
import math

import jax
import jax.numpy as jnp
from jax import lax
from jax.experimental import pallas as pl
from jax.experimental.pallas import tpu as pltpu

# ---- SSFTT hyper-parameters (module defaults) ----
DIM = 64                      # token embedding dim
NUM_TOKENS = 4                # learned tokens L; sequence = L + 1 (cls token)
HEADS = 8
HEAD_DIM = DIM // HEADS
MLP_DIM = 8                   # MLP hidden dim (lane-padded to 128 for the kernel)
NUM_CLASSES = 16
LANE = 128                    # TPU lane width
LN_EPS = 1e-5
ATTN_SCALE = DIM ** -0.5      # module uses dim**-0.5 (not head_dim**-0.5)
INV_SQRT2 = 1.0 / math.sqrt(2.0)


# ----------------------------------------------------------------------------
# In-kernel helpers
# ----------------------------------------------------------------------------
def _layer_norm(z, g, b):
    m = jnp.mean(z, axis=-1, keepdims=True)
    c = z - m
    v = jnp.mean(c * c, axis=-1, keepdims=True)
    return c * lax.rsqrt(v + LN_EPS) * g + b


def _softmax_last(z):
    z = z - jnp.max(z, axis=-1, keepdims=True)
    e = jnp.exp(z)
    return e / jnp.sum(e, axis=-1, keepdims=True)


def _gelu_exact(z):
    # Matches PyTorch nn.GELU() default (erf form).
    return 0.5 * z * (1.0 + lax.erf(z * INV_SQRT2))


# ----------------------------------------------------------------------------
# Fused SSFTT head kernel: token learner + transformer layer + classifier.
# One grid step per batch element; all params resident (constant index_map).
# ----------------------------------------------------------------------------
def _ssftt_head_kernel(x_ref, wa_ref, wv_ref, cls_ref, pos_ref,
                       g1_ref, b1_ref, wqkv_ref, bqkv_ref, wo_ref, bo_ref,
                       g2_ref, b2_ref, wm1_ref, bm1_ref, wm2_ref, bm2_ref,
                       wc_ref, bc_ref, out_ref):
    x = x_ref[0]                                        # [S, D] conv features

    # ---- token learner: A = softmax(wA @ x^T); T = A @ (x @ wV) ----
    a_t = lax.dot_general(wa_ref[...], x, (((1,), (1,)), ((), ())),
                          preferred_element_type=jnp.float32)       # [L, S]
    a_sm = _softmax_last(a_t)
    vv = jnp.dot(x, wv_ref[...], preferred_element_type=jnp.float32)    # [S, D]
    t_tok = jnp.dot(a_sm, vv, preferred_element_type=jnp.float32)       # [L, D]
    tokens = jnp.concatenate([cls_ref[...], t_tok], axis=0) + pos_ref[...]  # [N, D]
    # emb dropout: eval-mode identity.

    # ---- transformer layer: pre-LN multi-head attention + residual ----
    y = _layer_norm(tokens, g1_ref[...], b1_ref[...])
    qkv = jnp.dot(y, wqkv_ref[...],
                  preferred_element_type=jnp.float32) + bqkv_ref[...]    # [N, 3D]
    head_outs = []
    for h in range(HEADS):
        lo = h * HEAD_DIM
        q = qkv[:, lo:lo + HEAD_DIM]
        k = qkv[:, DIM + lo:DIM + lo + HEAD_DIM]
        v = qkv[:, 2 * DIM + lo:2 * DIM + lo + HEAD_DIM]
        dots = lax.dot_general(q, k, (((1,), (1,)), ((), ())),
                               preferred_element_type=jnp.float32) * ATTN_SCALE
        head_outs.append(jnp.dot(_softmax_last(dots), v,
                                 preferred_element_type=jnp.float32))
    attn = jnp.concatenate(head_outs, axis=-1)                           # [N, D]
    attn = jnp.dot(attn, wo_ref[...],
                   preferred_element_type=jnp.float32) + bo_ref[...]
    x1 = tokens + attn                                                   # residual

    # ---- pre-LN MLP (hidden lane-padded to 128 with zeros) + residual ----
    y2 = _layer_norm(x1, g2_ref[...], b2_ref[...])
    hmid = jnp.dot(y2, wm1_ref[...],
                   preferred_element_type=jnp.float32) + bm1_ref[...]    # [N, 128]
    hmid = _gelu_exact(hmid)
    mlp = jnp.dot(hmid, wm2_ref[...],
                  preferred_element_type=jnp.float32) + bm2_ref[...]
    x2 = x1 + mlp

    # ---- classifier on the cls token (output lane-padded to 128) ----
    logits = jnp.dot(x2[0:1, :], wc_ref[...],
                     preferred_element_type=jnp.float32) + bc_ref[...]   # [1, 128]
    # Broadcast to a full (8, 128) tile so the store is unmasked & lane-dense.
    out_ref[0] = jnp.broadcast_to(logits, (8, logits.shape[-1])).astype(out_ref.dtype)


def _pad_lanes(a, target, axis):
    pad = target - a.shape[axis]
    if pad <= 0:
        return a
    widths = [(0, 0)] * a.ndim
    widths[axis] = (0, pad)
    return jnp.pad(a, widths)


def ssftt_head_pallas(feats, p):
    """feats: [B, S, 64] conv features -> logits [B, num_classes]."""
    B, S, D = feats.shape
    assert D == DIM
    n_cls = p['w_cls'].shape[1]
    Hp = LANE   # padded MLP hidden
    Cp = LANE   # padded classifier output

    # Zero-padding keeps the math exact: GELU(0)=0 and padded rows of w_m2 /
    # padded cols of w_cls are zero.
    w_m1 = _pad_lanes(p['w_m1'], Hp, 1)
    b_m1 = _pad_lanes(p['b_m1'], Hp, 1)
    w_m2 = jnp.pad(p['w_m2'], ((0, Hp - p['w_m2'].shape[0]), (0, 0)))
    w_cls = _pad_lanes(p['w_cls'], Cp, 1)
    b_cls = _pad_lanes(p['b_cls'], Cp, 1)

    def full2d(arr):  # whole-array block (block_shape == full dims is allowed)
        return pl.BlockSpec(arr.shape, lambda b: (0, 0))

    out = pl.pallas_call(
        _ssftt_head_kernel,
        out_shape=jax.ShapeDtypeStruct((B, 8, Cp), feats.dtype),
        grid_spec=pltpu.PrefetchScalarGridSpec(
            num_scalar_prefetch=0,
            grid=(B,),
            in_specs=[
                pl.BlockSpec((1, S, D), lambda b: (b, 0, 0)),   # per-batch features
                full2d(p['token_wA']), full2d(p['token_wV']),
                full2d(p['cls_token']), full2d(p['pos_embedding']),
                full2d(p['ln1_g']), full2d(p['ln1_b']),
                full2d(p['w_qkv']), full2d(p['b_qkv']),
                full2d(p['w_o']), full2d(p['b_o']),
                full2d(p['ln2_g']), full2d(p['ln2_b']),
                full2d(w_m1), full2d(b_m1),
                full2d(w_m2), full2d(p['b_m2']),
                full2d(w_cls), full2d(b_cls),
            ],
            out_specs=pl.BlockSpec((1, 8, Cp), lambda b: (b, 0, 0)),
        ),
        compiler_params=pltpu.CompilerParams(
            dimension_semantics=("parallel",)),   # batch axis -> megacore on v7x
    )(feats, p['token_wA'], p['token_wV'], p['cls_token'], p['pos_embedding'],
      p['ln1_g'], p['ln1_b'], p['w_qkv'], p['b_qkv'], p['w_o'], p['b_o'],
      p['ln2_g'], p['ln2_b'], w_m1, b_m1, w_m2, p['b_m2'], w_cls, b_cls)

    return out[:, 0, :n_cls]


# ----------------------------------------------------------------------------
# Conv feature extractor (XLA) -- shared by kernel path and reference.
# ----------------------------------------------------------------------------
def _bn_eval(y, gamma, beta, mean, var, eps=1e-5):
    shape = (1, -1) + (1,) * (y.ndim - 2)
    scale = gamma.reshape(shape) * lax.rsqrt(var.reshape(shape) + eps)
    return (y - mean.reshape(shape)) * scale + beta.reshape(shape)


def conv_features(x, p):
    # Conv3d(1->8, k=3) + BN3d(eval) + ReLU
    y = lax.conv_general_dilated(
        x, p['conv3d_w'], window_strides=(1, 1, 1), padding='VALID',
        dimension_numbers=('NCDHW', 'OIDHW', 'NCDHW'))
    y = y + p['conv3d_b'].reshape(1, -1, 1, 1, 1)
    y = jnp.maximum(_bn_eval(y, p['bn3_g'], p['bn3_b'], p['bn3_m'], p['bn3_v']), 0.0)
    # rearrange 'b c h w y -> b (c h) w y'
    b, c, d, h, w = y.shape
    y = y.reshape(b, c * d, h, w)
    # Conv2d(1584->64, k=3) + BN2d(eval) + ReLU
    y = lax.conv_general_dilated(
        y, p['conv2d_w'], window_strides=(1, 1), padding='VALID',
        dimension_numbers=('NCHW', 'OIHW', 'NCHW'))
    y = y + p['conv2d_b'].reshape(1, -1, 1, 1)
    y = jnp.maximum(_bn_eval(y, p['bn2_g'], p['bn2_b'], p['bn2_m'], p['bn2_v']), 0.0)
    # rearrange 'b c h w -> b (h w) c'
    b, c, h, w = y.shape
    return jnp.transpose(y, (0, 2, 3, 1)).reshape(b, h * w, c)


@jax.jit
def ssftt_forward(x, params):
    feats = conv_features(x, params)
    return ssftt_head_pallas(feats, params)


# ----------------------------------------------------------------------------
# Pure-JAX reference of the head (for validation).
# ----------------------------------------------------------------------------
def _reference_head(feats, p):
    B, S, D = feats.shape
    hp = lax.Precision.HIGHEST
    A = jnp.einsum('bsd,ld->bls', feats, p['token_wA'], precision=hp)
    A = jax.nn.softmax(A, axis=-1)
    VV = jnp.einsum('bsd,de->bse', feats, p['token_wV'], precision=hp)
    T = jnp.einsum('bls,bsd->bld', A, VV, precision=hp)
    cls = jnp.broadcast_to(p['cls_token'][None], (B, 1, D))
    xt = jnp.concatenate([cls, T], axis=1) + p['pos_embedding'][None]

    def ln(z, g, b):
        m = jnp.mean(z, axis=-1, keepdims=True)
        c = z - m
        v = jnp.mean(c * c, axis=-1, keepdims=True)
        return c * lax.rsqrt(v + LN_EPS) * g + b

    y = ln(xt, p['ln1_g'], p['ln1_b'])
    qkv = jnp.einsum('bnd,df->bnf', y, p['w_qkv'], precision=hp) + p['b_qkv']
    q, k, v = jnp.split(qkv, 3, axis=-1)
    sh = lambda t: t.reshape(B, -1, HEADS, HEAD_DIM).transpose(0, 2, 1, 3)
    q, k, v = sh(q), sh(k), sh(v)
    dots = jnp.einsum('bhid,bhjd->bhij', q, k, precision=hp) * ATTN_SCALE
    attn = jax.nn.softmax(dots, axis=-1)
    o = jnp.einsum('bhij,bhjd->bhid', attn, v, precision=hp)
    o = o.transpose(0, 2, 1, 3).reshape(B, -1, D)
    o = jnp.einsum('bnd,de->bne', o, p['w_o'], precision=hp) + p['b_o']
    x1 = xt + o
    y2 = ln(x1, p['ln2_g'], p['ln2_b'])
    hm = jnp.einsum('bnd,dh->bnh', y2, p['w_m1'], precision=hp) + p['b_m1']
    hm = 0.5 * hm * (1.0 + lax.erf(hm * INV_SQRT2))
    x2 = x1 + jnp.einsum('bnh,hd->bnd', hm, p['w_m2'], precision=hp) + p['b_m2']
    return jnp.einsum('bd,dc->bc', x2[:, 0], p['w_cls'], precision=hp) + p['b_cls']


@jax.jit
def ssftt_reference(x, params):
    return _reference_head(conv_features(x, params), params)


# ----------------------------------------------------------------------------
# Deterministic parameter init (shapes/semantics of the PyTorch module; eval mode).
# Weights stored [in, out] so kernels compute x @ W + b.
# ----------------------------------------------------------------------------
def _uniform(key, shape, bound):
    return jax.random.uniform(key, shape, jnp.float32, -bound, bound)


def init_params(key, num_classes=NUM_CLASSES):
    ks = jax.random.split(key, 17)
    p = {}
    f3 = 1 * 27
    p['conv3d_w'] = _uniform(ks[0], (8, 1, 3, 3, 3), 1.0 / math.sqrt(f3))
    p['conv3d_b'] = _uniform(ks[1], (8,), 1.0 / math.sqrt(f3))
    p['bn3_g'], p['bn3_b'] = jnp.ones((8,)), jnp.zeros((8,))
    p['bn3_m'], p['bn3_v'] = jnp.zeros((8,)), jnp.ones((8,))
    f2 = 1584 * 9
    p['conv2d_w'] = _uniform(ks[2], (64, 1584, 3, 3), 1.0 / math.sqrt(f2))
    p['conv2d_b'] = _uniform(ks[3], (64,), 1.0 / math.sqrt(f2))
    p['bn2_g'], p['bn2_b'] = jnp.ones((64,)), jnp.zeros((64,))
    p['bn2_m'], p['bn2_v'] = jnp.zeros((64,)), jnp.ones((64,))
    # token learner + embeddings
    p['token_wA'] = jax.random.normal(ks[4], (NUM_TOKENS, DIM)) * math.sqrt(2.0 / (NUM_TOKENS + DIM))
    p['token_wV'] = jax.random.normal(ks[5], (DIM, DIM)) * math.sqrt(2.0 / (2 * DIM))
    p['pos_embedding'] = jax.random.normal(ks[6], (NUM_TOKENS + 1, DIM)) * 0.02
    p['cls_token'] = jnp.zeros((1, DIM))
    # transformer layer (depth=1)
    bd = 1.0 / math.sqrt(DIM)
    p['ln1_g'], p['ln1_b'] = jnp.ones((1, DIM)), jnp.zeros((1, DIM))
    p['w_qkv'] = _uniform(ks[7], (DIM, 3 * DIM), bd)
    p['b_qkv'] = _uniform(ks[8], (1, 3 * DIM), bd)
    p['w_o'] = _uniform(ks[9], (DIM, DIM), bd)
    p['b_o'] = _uniform(ks[10], (1, DIM), bd)
    p['ln2_g'], p['ln2_b'] = jnp.ones((1, DIM)), jnp.zeros((1, DIM))
    p['w_m1'] = _uniform(ks[11], (DIM, MLP_DIM), bd)
    p['b_m1'] = _uniform(ks[12], (1, MLP_DIM), bd)
    bh = 1.0 / math.sqrt(MLP_DIM)
    p['w_m2'] = _uniform(ks[13], (MLP_DIM, DIM), bh)
    p['b_m2'] = _uniform(ks[14], (1, DIM), bh)
    # classifier
    xb = math.sqrt(6.0 / (DIM + num_classes))
    p['w_cls'] = _uniform(ks[15], (DIM, num_classes), xb)
    p['b_cls'] = jax.random.normal(ks[16], (1, num_classes)) * 1e-6
    return p


if __name__ == "__main__":
    # Bands must be 200 so 8*(200-2)=1584 matches the module's conv2d in_channels.
    B, BANDS, PATCH = 2, 200, 9
    key = jax.random.PRNGKey(0)
    kx, kp = jax.random.split(key)
    x = jax.random.normal(kx, (B, 1, BANDS, PATCH, PATCH), dtype=jnp.float32)
    params = init_params(kp, num_classes=NUM_CLASSES)

    out = jax.block_until_ready(ssftt_forward(x, params))
    ref = jax.block_until_ready(ssftt_reference(x, params))

    assert out.shape == (B, NUM_CLASSES), out.shape
    max_err = float(jnp.max(jnp.abs(out - ref)))
    assert max_err < 5e-2, f"kernel/reference mismatch: max abs err = {max_err}"
    print("KERNEL_OK")
</pallas_src>

<mosaic_0001>
module attributes {stable_mosaic.version = 11 : i64} {
  func.func @_ssftt_head_kernel(%arg0: i32, %arg1: memref<1x25x64xf32, #tpu.memory_space<vmem>>, %arg2: memref<4x64xf32, #tpu.memory_space<vmem>>, %arg3: memref<64x64xf32, #tpu.memory_space<vmem>>, %arg4: memref<1x64xf32, #tpu.memory_space<vmem>>, %arg5: memref<5x64xf32, #tpu.memory_space<vmem>>, %arg6: memref<1x64xf32, #tpu.memory_space<vmem>>, %arg7: memref<1x64xf32, #tpu.memory_space<vmem>>, %arg8: memref<64x192xf32, #tpu.memory_space<vmem>>, %arg9: memref<1x192xf32, #tpu.memory_space<vmem>>, %arg10: memref<64x64xf32, #tpu.memory_space<vmem>>, %arg11: memref<1x64xf32, #tpu.memory_space<vmem>>, %arg12: memref<1x64xf32, #tpu.memory_space<vmem>>, %arg13: memref<1x64xf32, #tpu.memory_space<vmem>>, %arg14: memref<64x128xf32, #tpu.memory_space<vmem>>, %arg15: memref<1x128xf32, #tpu.memory_space<vmem>>, %arg16: memref<128x64xf32, #tpu.memory_space<vmem>>, %arg17: memref<1x64xf32, #tpu.memory_space<vmem>>, %arg18: memref<64x128xf32, #tpu.memory_space<vmem>>, %arg19: memref<1x128xf32, #tpu.memory_space<vmem>>, %arg20: memref<1x8x128xf32, #tpu.memory_space<vmem>>) attributes {dimension_semantics = [#tpu.dimension_semantics<parallel>], iteration_bounds = array<i64: 2>, scalar_prefetch = 0 : i64, scratch_operands = 0 : i64, tpu.core_type = #tpu.core_type<tc>, window_params = [{transform_indices = @transform_0, window_bounds = array<i64: 1, 25, 64>}, {pipeline_mode = #tpu.pipeline_mode<synchronous>, transform_indices = @transform_1, window_bounds = array<i64: 4, 64>}, {pipeline_mode = #tpu.pipeline_mode<synchronous>, transform_indices = @transform_2, window_bounds = array<i64: 64, 64>}, {pipeline_mode = #tpu.pipeline_mode<synchronous>, transform_indices = @transform_3, window_bounds = array<i64: 1, 64>}, {pipeline_mode = #tpu.pipeline_mode<synchronous>, transform_indices = @transform_4, window_bounds = array<i64: 5, 64>}, {pipeline_mode = #tpu.pipeline_mode<synchronous>, transform_indices = @transform_5, window_bounds = array<i64: 1, 64>}, {pipeline_mode = #tpu.pipeline_mode<synchronous>, transform_indices = @transform_6, window_bounds = array<i64: 1, 64>}, {pipeline_mode = #tpu.pipeline_mode<synchronous>, transform_indices = @transform_7, window_bounds = array<i64: 64, 192>}, {pipeline_mode = #tpu.pipeline_mode<synchronous>, transform_indices = @transform_8, window_bounds = array<i64: 1, 192>}, {pipeline_mode = #tpu.pipeline_mode<synchronous>, transform_indices = @transform_9, window_bounds = array<i64: 64, 64>}, {pipeline_mode = #tpu.pipeline_mode<synchronous>, transform_indices = @transform_10, window_bounds = array<i64: 1, 64>}, {pipeline_mode = #tpu.pipeline_mode<synchronous>, transform_indices = @transform_11, window_bounds = array<i64: 1, 64>}, {pipeline_mode = #tpu.pipeline_mode<synchronous>, transform_indices = @transform_12, window_bounds = array<i64: 1, 64>}, {pipeline_mode = #tpu.pipeline_mode<synchronous>, transform_indices = @transform_13, window_bounds = array<i64: 64, 128>}, {pipeline_mode = #tpu.pipeline_mode<synchronous>, transform_indices = @transform_14, window_bounds = array<i64: 1, 128>}, {pipeline_mode = #tpu.pipeline_mode<synchronous>, transform_indices = @transform_15, window_bounds = array<i64: 128, 64>}, {pipeline_mode = #tpu.pipeline_mode<synchronous>, transform_indices = @transform_16, window_bounds = array<i64: 1, 64>}, {pipeline_mode = #tpu.pipeline_mode<synchronous>, transform_indices = @transform_17, window_bounds = array<i64: 64, 128>}, {pipeline_mode = #tpu.pipeline_mode<synchronous>, transform_indices = @transform_18, window_bounds = array<i64: 1, 128>}, {transform_indices = @transform_19, window_bounds = array<i64: 1, 8, 128>}]} {
    %c0 = arith.constant 0 : index
    %c0_0 = arith.constant 0 : index
    %c0_1 = arith.constant 0 : index
    %0 = vector.load %arg1[%c0, %c0_0, %c0_1] : memref<1x25x64xf32, #tpu.memory_space<vmem>>, vector<1x25x64xf32>
    %1 = vector.shape_cast %0 : vector<1x25x64xf32> to vector<25x64xf32>
    %c0_2 = arith.constant 0 : index
    %c0_3 = arith.constant 0 : index
    %2 = vector.load %arg2[%c0_2, %c0_3] : memref<4x64xf32, #tpu.memory_space<vmem>>, vector<4x64xf32>
    %cst = arith.constant dense<0.000000e+00> : vector<4x25xf32>
    %3 = tpu.matmul %2, %1, %cst {dimension_numbers = #tpu.dot_dimension_numbers<[1], [1], [0], [0], [0, 0, 1, 0], [], []>} : vector<4x64xf32>, vector<25x64xf32>, vector<4x25xf32> -> vector<4x25xf32>
    %cst_4 = arith.constant dense<0xFF800000> : vector<4xf32>
    %4 = vector.multi_reduction <maximumf>, %3, %cst_4 [1] : vector<4x25xf32> to vector<4xf32>
    %5 = vector.shape_cast %4 : vector<4xf32> to vector<4x1xf32>
    %6 = vector.broadcast %5 : vector<4x1xf32> to vector<4x25xf32>
    %7 = arith.subf %3, %6 : vector<4x25xf32>
    %8 = math.exp %7 : vector<4x25xf32>
    %cst_5 = arith.constant dense<0.000000e+00> : vector<4xf32>
    %9 = vector.multi_reduction <add>, %8, %cst_5 [1] : vector<4x25xf32> to vector<4xf32>
    %10 = vector.shape_cast %9 : vector<4xf32> to vector<4x1xf32>
    %11 = vector.broadcast %10 : vector<4x1xf32> to vector<4x25xf32>
    %12 = arith.divf %8, %11 : vector<4x25xf32>
    %c0_6 = arith.constant 0 : index
    %c0_7 = arith.constant 0 : index
    %13 = vector.load %arg3[%c0_6, %c0_7] : memref<64x64xf32, #tpu.memory_space<vmem>>, vector<64x64xf32>
    %cst_8 = arith.constant dense<0.000000e+00> : vector<25x64xf32>
    %14 = tpu.matmul %1, %13, %cst_8 {dimension_numbers = #tpu.dot_dimension_numbers<[1], [0], [0], [1], [0, 0, 1, 1], [], []>} : vector<25x64xf32>, vector<64x64xf32>, vector<25x64xf32> -> vector<25x64xf32>
    %cst_9 = arith.constant dense<0.000000e+00> : vector<4x64xf32>
    %15 = tpu.matmul %12, %14, %cst_9 {dimension_numbers = #tpu.dot_dimension_numbers<[1], [0], [0], [1], [0, 0, 1, 1], [], []>} : vector<4x25xf32>, vector<25x64xf32>, vector<4x64xf32> -> vector<4x64xf32>
    %c0_10 = arith.constant 0 : index
    %c0_11 = arith.constant 0 : index
    %16 = vector.load %arg4[%c0_10, %c0_11] : memref<1x64xf32, #tpu.memory_space<vmem>>, vector<1x64xf32>
    %17 = tpu.concatenate %16, %15 in 0 : vector<1x64xf32>, vector<4x64xf32> -> vector<5x64xf32>
    %c0_12 = arith.constant 0 : index
    %c0_13 = arith.constant 0 : index
    %18 = vector.load %arg5[%c0_12, %c0_13] : memref<5x64xf32, #tpu.memory_space<vmem>>, vector<5x64xf32>
    %19 = arith.addf %17, %18 : vector<5x64xf32>
    %c0_14 = arith.constant 0 : index
    %c0_15 = arith.constant 0 : index
    %20 = vector.load %arg6[%c0_14, %c0_15] : memref<1x64xf32, #tpu.memory_space<vmem>>, vector<1x64xf32>
    %c0_16 = arith.constant 0 : index
    %c0_17 = arith.constant 0 : index
    %21 = vector.load %arg7[%c0_16, %c0_17] : memref<1x64xf32, #tpu.memory_space<vmem>>, vector<1x64xf32>
    %cst_18 = arith.constant dense<0.000000e+00> : vector<5xf32>
    %22 = vector.multi_reduction <add>, %19, %cst_18 [1] : vector<5x64xf32> to vector<5xf32>
    %23 = vector.shape_cast %22 : vector<5xf32> to vector<5x1xf32>
    %cst_19 = arith.constant 6.400000e+01 : f32
    %24 = vector.broadcast %cst_19 : f32 to vector<5x1xf32>
    %25 = arith.divf %23, %24 : vector<5x1xf32>
    %26 = vector.broadcast %25 : vector<5x1xf32> to vector<5x64xf32>
    %27 = arith.subf %19, %26 : vector<5x64xf32>
    %28 = arith.mulf %27, %27 : vector<5x64xf32>
    %cst_20 = arith.constant dense<0.000000e+00> : vector<5xf32>
    %29 = vector.multi_reduction <add>, %28, %cst_20 [1] : vector<5x64xf32> to vector<5xf32>
    %30 = vector.shape_cast %29 : vector<5xf32> to vector<5x1xf32>
    %cst_21 = arith.constant 6.400000e+01 : f32
    %31 = vector.broadcast %cst_21 : f32 to vector<5x1xf32>
    %32 = arith.divf %30, %31 : vector<5x1xf32>
    %cst_22 = arith.constant 9.99999974E-6 : f32
    %33 = vector.broadcast %cst_22 : f32 to vector<5x1xf32>
    %34 = arith.addf %32, %33 : vector<5x1xf32>
    %35 = math.rsqrt %34 : vector<5x1xf32>
    %36 = vector.broadcast %35 : vector<5x1xf32> to vector<5x64xf32>
    %37 = arith.mulf %27, %36 : vector<5x64xf32>
    %38 = vector.broadcast %20 : vector<1x64xf32> to vector<5x64xf32>
    %39 = arith.mulf %37, %38 : vector<5x64xf32>
    %40 = vector.broadcast %21 : vector<1x64xf32> to vector<5x64xf32>
    %41 = arith.addf %39, %40 : vector<5x64xf32>
    %c0_23 = arith.constant 0 : index
    %c0_24 = arith.constant 0 : index
    %42 = vector.load %arg8[%c0_23, %c0_24] : memref<64x192xf32, #tpu.memory_space<vmem>>, vector<64x192xf32>
    %cst_25 = arith.constant dense<0.000000e+00> : vector<5x192xf32>
    %43 = tpu.matmul %41, %42, %cst_25 {dimension_numbers = #tpu.dot_dimension_numbers<[1], [0], [0], [1], [0, 0, 1, 1], [], []>} : vector<5x64xf32>, vector<64x192xf32>, vector<5x192xf32> -> vector<5x192xf32>
    %c0_26 = arith.constant 0 : index
    %c0_27 = arith.constant 0 : index
    %44 = vector.load %arg9[%c0_26, %c0_27] : memref<1x192xf32, #tpu.memory_space<vmem>>, vector<1x192xf32>
    %45 = vector.broadcast %44 : vector<1x192xf32> to vector<5x192xf32>
    %46 = arith.addf %43, %45 : vector<5x192xf32>
    %47 = vector.extract_strided_slice %46 {offsets = [0, 0], sizes = [5, 8], strides = [1, 1]} : vector<5x192xf32> to vector<5x8xf32>
    %48 = vector.extract_strided_slice %46 {offsets = [0, 64], sizes = [5, 8], strides = [1, 1]} : vector<5x192xf32> to vector<5x8xf32>
    %49 = vector.extract_strided_slice %46 {offsets = [0, 128], sizes = [5, 8], strides = [1, 1]} : vector<5x192xf32> to vector<5x8xf32>
    %cst_28 = arith.constant dense<0.000000e+00> : vector<5x5xf32>
    %50 = tpu.matmul %47, %48, %cst_28 {dimension_numbers = #tpu.dot_dimension_numbers<[1], [1], [0], [0], [0, 0, 1, 0], [], []>} : vector<5x8xf32>, vector<5x8xf32>, vector<5x5xf32> -> vector<5x5xf32>
    %cst_29 = arith.constant 1.250000e-01 : f32
    %51 = vector.broadcast %cst_29 : f32 to vector<5x5xf32>
    %52 = arith.mulf %50, %51 : vector<5x5xf32>
    %cst_30 = arith.constant dense<0xFF800000> : vector<5xf32>
    %53 = vector.multi_reduction <maximumf>, %52, %cst_30 [1] : vector<5x5xf32> to vector<5xf32>
    %54 = vector.shape_cast %53 : vector<5xf32> to vector<5x1xf32>
    %55 = vector.broadcast %54 : vector<5x1xf32> to vector<5x5xf32>
    %56 = arith.subf %52, %55 : vector<5x5xf32>
    %57 = math.exp %56 : vector<5x5xf32>
    %cst_31 = arith.constant dense<0.000000e+00> : vector<5xf32>
    %58 = vector.multi_reduction <add>, %57, %cst_31 [1] : vector<5x5xf32> to vector<5xf32>
    %59 = vector.shape_cast %58 : vector<5xf32> to vector<5x1xf32>
    %60 = vector.broadcast %59 : vector<5x1xf32> to vector<5x5xf32>
    %61 = arith.divf %57, %60 : vector<5x5xf32>
    %cst_32 = arith.constant dense<0.000000e+00> : vector<5x8xf32>
    %62 = tpu.matmul %61, %49, %cst_32 {dimension_numbers = #tpu.dot_dimension_numbers<[1], [0], [0], [1], [0, 0, 1, 1], [], []>} : vector<5x5xf32>, vector<5x8xf32>, vector<5x8xf32> -> vector<5x8xf32>
    %63 = vector.extract_strided_slice %46 {offsets = [0, 8], sizes = [5, 8], strides = [1, 1]} : vector<5x192xf32> to vector<5x8xf32>
    %64 = vector.extract_strided_slice %46 {offsets = [0, 72], sizes = [5, 8], strides = [1, 1]} : vector<5x192xf32> to vector<5x8xf32>
    %65 = vector.extract_strided_slice %46 {offsets = [0, 136], sizes = [5, 8], strides = [1, 1]} : vector<5x192xf32> to vector<5x8xf32>
    %cst_33 = arith.constant dense<0.000000e+00> : vector<5x5xf32>
    %66 = tpu.matmul %63, %64, %cst_33 {dimension_numbers = #tpu.dot_dimension_numbers<[1], [1], [0], [0], [0, 0, 1, 0], [], []>} : vector<5x8xf32>, vector<5x8xf32>, vector<5x5xf32> -> vector<5x5xf32>
    %cst_34 = arith.constant 1.250000e-01 : f32
    %67 = vector.broadcast %cst_34 : f32 to vector<5x5xf32>
    %68 = arith.mulf %66, %67 : vector<5x5xf32>
    %cst_35 = arith.constant dense<0xFF800000> : vector<5xf32>
    %69 = vector.multi_reduction <maximumf>, %68, %cst_35 [1] : vector<5x5xf32> to vector<5xf32>
    %70 = vector.shape_cast %69 : vector<5xf32> to vector<5x1xf32>
    %71 = vector.broadcast %70 : vector<5x1xf32> to vector<5x5xf32>
    %72 = arith.subf %68, %71 : vector<5x5xf32>
    %73 = math.exp %72 : vector<5x5xf32>
    %cst_36 = arith.constant dense<0.000000e+00> : vector<5xf32>
    %74 = vector.multi_reduction <add>, %73, %cst_36 [1] : vector<5x5xf32> to vector<5xf32>
    %75 = vector.shape_cast %74 : vector<5xf32> to vector<5x1xf32>
    %76 = vector.broadcast %75 : vector<5x1xf32> to vector<5x5xf32>
    %77 = arith.divf %73, %76 : vector<5x5xf32>
    %cst_37 = arith.constant dense<0.000000e+00> : vector<5x8xf32>
    %78 = tpu.matmul %77, %65, %cst_37 {dimension_numbers = #tpu.dot_dimension_numbers<[1], [0], [0], [1], [0, 0, 1, 1], [], []>} : vector<5x5xf32>, vector<5x8xf32>, vector<5x8xf32> -> vector<5x8xf32>
    %79 = vector.extract_strided_slice %46 {offsets = [0, 16], sizes = [5, 8], strides = [1, 1]} : vector<5x192xf32> to vector<5x8xf32>
    %80 = vector.extract_strided_slice %46 {offsets = [0, 80], sizes = [5, 8], strides = [1, 1]} : vector<5x192xf32> to vector<5x8xf32>
    %81 = vector.extract_strided_slice %46 {offsets = [0, 144], sizes = [5, 8], strides = [1, 1]} : vector<5x192xf32> to vector<5x8xf32>
    %cst_38 = arith.constant dense<0.000000e+00> : vector<5x5xf32>
    %82 = tpu.matmul %79, %80, %cst_38 {dimension_numbers = #tpu.dot_dimension_numbers<[1], [1], [0], [0], [0, 0, 1, 0], [], []>} : vector<5x8xf32>, vector<5x8xf32>, vector<5x5xf32> -> vector<5x5xf32>
    %cst_39 = arith.constant 1.250000e-01 : f32
    %83 = vector.broadcast %cst_39 : f32 to vector<5x5xf32>
    %84 = arith.mulf %82, %83 : vector<5x5xf32>
    %cst_40 = arith.constant dense<0xFF800000> : vector<5xf32>
    %85 = vector.multi_reduction <maximumf>, %84, %cst_40 [1] : vector<5x5xf32> to vector<5xf32>
    %86 = vector.shape_cast %85 : vector<5xf32> to vector<5x1xf32>
    %87 = vector.broadcast %86 : vector<5x1xf32> to vector<5x5xf32>
    %88 = arith.subf %84, %87 : vector<5x5xf32>
    %89 = math.exp %88 : vector<5x5xf32>
    %cst_41 = arith.constant dense<0.000000e+00> : vector<5xf32>
    %90 = vector.multi_reduction <add>, %89, %cst_41 [1] : vector<5x5xf32> to vector<5xf32>
    %91 = vector.shape_cast %90 : vector<5xf32> to vector<5x1xf32>
    %92 = vector.broadcast %91 : vector<5x1xf32> to vector<5x5xf32>
    %93 = arith.divf %89, %92 : vector<5x5xf32>
    %cst_42 = arith.constant dense<0.000000e+00> : vector<5x8xf32>
    %94 = tpu.matmul %93, %81, %cst_42 {dimension_numbers = #tpu.dot_dimension_numbers<[1], [0], [0], [1], [0, 0, 1, 1], [], []>} : vector<5x5xf32>, vector<5x8xf32>, vector<5x8xf32> -> vector<5x8xf32>
    %95 = vector.extract_strided_slice %46 {offsets = [0, 24], sizes = [5, 8], strides = [1, 1]} : vector<5x192xf32> to vector<5x8xf32>
    %96 = vector.extract_strided_slice %46 {offsets = [0, 88], sizes = [5, 8], strides = [1, 1]} : vector<5x192xf32> to vector<5x8xf32>
    %97 = vector.extract_strided_slice %46 {offsets = [0, 152], sizes = [5, 8], strides = [1, 1]} : vector<5x192xf32> to vector<5x8xf32>
    %cst_43 = arith.constant dense<0.000000e+00> : vector<5x5xf32>
    %98 = tpu.matmul %95, %96, %cst_43 {dimension_numbers = #tpu.dot_dimension_numbers<[1], [1], [0], [0], [0, 0, 1, 0], [], []>} : vector<5x8xf32>, vector<5x8xf32>, vector<5x5xf32> -> vector<5x5xf32>
    %cst_44 = arith.constant 1.250000e-01 : f32
    %99 = vector.broadcast %cst_44 : f32 to vector<5x5xf32>
    %100 = arith.mulf %98, %99 : vector<5x5xf32>
    %cst_45 = arith.constant dense<0xFF800000> : vector<5xf32>
    %101 = vector.multi_reduction <maximumf>, %100, %cst_45 [1] : vector<5x5xf32> to vector<5xf32>
    %102 = vector.shape_cast %101 : vector<5xf32> to vector<5x1xf32>
    %103 = vector.broadcast %102 : vector<5x1xf32> to vector<5x5xf32>
    %104 = arith.subf %100, %103 : vector<5x5xf32>
    %105 = math.exp %104 : vector<5x5xf32>
    %cst_46 = arith.constant dense<0.000000e+00> : vector<5xf32>
    %106 = vector.multi_reduction <add>, %105, %cst_46 [1] : vector<5x5xf32> to vector<5xf32>
    %107 = vector.shape_cast %106 : vector<5xf32> to vector<5x1xf32>
    %108 = vector.broadcast %107 : vector<5x1xf32> to vector<5x5xf32>
    %109 = arith.divf %105, %108 : vector<5x5xf32>
    %cst_47 = arith.constant dense<0.000000e+00> : vector<5x8xf32>
    %110 = tpu.matmul %109, %97, %cst_47 {dimension_numbers = #tpu.dot_dimension_numbers<[1], [0], [0], [1], [0, 0, 1, 1], [], []>} : vector<5x5xf32>, vector<5x8xf32>, vector<5x8xf32> -> vector<5x8xf32>
    %111 = vector.extract_strided_slice %46 {offsets = [0, 32], sizes = [5, 8], strides = [1, 1]} : vector<5x192xf32> to vector<5x8xf32>
    %112 = vector.extract_strided_slice %46 {offsets = [0, 96], sizes = [5, 8], strides = [1, 1]} : vector<5x192xf32> to vector<5x8xf32>
    %113 = vector.extract_strided_slice %46 {offsets = [0, 160], sizes = [5, 8], strides = [1, 1]} : vector<5x192xf32> to vector<5x8xf32>
    %cst_48 = arith.constant dense<0.000000e+00> : vector<5x5xf32>
    %114 = tpu.matmul %111, %112, %cst_48 {dimension_numbers = #tpu.dot_dimension_numbers<[1], [1], [0], [0], [0, 0, 1, 0], [], []>} : vector<5x8xf32>, vector<5x8xf32>, vector<5x5xf32> -> vector<5x5xf32>
    %cst_49 = arith.constant 1.250000e-01 : f32
    %115 = vector.broadcast %cst_49 : f32 to vector<5x5xf32>
    %116 = arith.mulf %114, %115 : vector<5x5xf32>
    %cst_50 = arith.constant dense<0xFF800000> : vector<5xf32>
    %117 = vector.multi_reduction <maximumf>, %116, %cst_50 [1] : vector<5x5xf32> to vector<5xf32>
    %118 = vector.shape_cast %117 : vector<5xf32> to vector<5x1xf32>
    %119 = vector.broadcast %118 : vector<5x1xf32> to vector<5x5xf32>
    %120 = arith.subf %116, %119 : vector<5x5xf32>
    %121 = math.exp %120 : vector<5x5xf32>
    %cst_51 = arith.constant dense<0.000000e+00> : vector<5xf32>
    %122 = vector.multi_reduction <add>, %121, %cst_51 [1] : vector<5x5xf32> to vector<5xf32>
    %123 = vector.shape_cast %122 : vector<5xf32> to vector<5x1xf32>
    %124 = vector.broadcast %123 : vector<5x1xf32> to vector<5x5xf32>
    %125 = arith.divf %121, %124 : vector<5x5xf32>
    %cst_52 = arith.constant dense<0.000000e+00> : vector<5x8xf32>
    %126 = tpu.matmul %125, %113, %cst_52 {dimension_numbers = #tpu.dot_dimension_numbers<[1], [0], [0], [1], [0, 0, 1, 1], [], []>} : vector<5x5xf32>, vector<5x8xf32>, vector<5x8xf32> -> vector<5x8xf32>
    %127 = vector.extract_strided_slice %46 {offsets = [0, 40], sizes = [5, 8], strides = [1, 1]} : vector<5x192xf32> to vector<5x8xf32>
    %128 = vector.extract_strided_slice %46 {offsets = [0, 104], sizes = [5, 8], strides = [1, 1]} : vector<5x192xf32> to vector<5x8xf32>
    %129 = vector.extract_strided_slice %46 {offsets = [0, 168], sizes = [5, 8], strides = [1, 1]} : vector<5x192xf32> to vector<5x8xf32>
    %cst_53 = arith.constant dense<0.000000e+00> : vector<5x5xf32>
    %130 = tpu.matmul %127, %128, %cst_53 {dimension_numbers = #tpu.dot_dimension_numbers<[1], [1], [0], [0], [0, 0, 1, 0], [], []>} : vector<5x8xf32>, vector<5x8xf32>, vector<5x5xf32> -> vector<5x5xf32>
    %cst_54 = arith.constant 1.250000e-01 : f32
    %131 = vector.broadcast %cst_54 : f32 to vector<5x5xf32>
    %132 = arith.mulf %130, %131 : vector<5x5xf32>
    %cst_55 = arith.constant dense<0xFF800000> : vector<5xf32>
    %133 = vector.multi_reduction <maximumf>, %132, %cst_55 [1] : vector<5x5xf32> to vector<5xf32>
    %134 = vector.shape_cast %133 : vector<5xf32> to vector<5x1xf32>
    %135 = vector.broadcast %134 : vector<5x1xf32> to vector<5x5xf32>
    %136 = arith.subf %132, %135 : vector<5x5xf32>
    %137 = math.exp %136 : vector<5x5xf32>
    %cst_56 = arith.constant dense<0.000000e+00> : vector<5xf32>
    %138 = vector.multi_reduction <add>, %137, %cst_56 [1] : vector<5x5xf32> to vector<5xf32>
    %139 = vector.shape_cast %138 : vector<5xf32> to vector<5x1xf32>
    %140 = vector.broadcast %139 : vector<5x1xf32> to vector<5x5xf32>
    %141 = arith.divf %137, %140 : vector<5x5xf32>
    %cst_57 = arith.constant dense<0.000000e+00> : vector<5x8xf32>
    %142 = tpu.matmul %141, %129, %cst_57 {dimension_numbers = #tpu.dot_dimension_numbers<[1], [0], [0], [1], [0, 0, 1, 1], [], []>} : vector<5x5xf32>, vector<5x8xf32>, vector<5x8xf32> -> vector<5x8xf32>
    %143 = vector.extract_strided_slice %46 {offsets = [0, 48], sizes = [5, 8], strides = [1, 1]} : vector<5x192xf32> to vector<5x8xf32>
    %144 = vector.extract_strided_slice %46 {offsets = [0, 112], sizes = [5, 8], strides = [1, 1]} : vector<5x192xf32> to vector<5x8xf32>
    %145 = vector.extract_strided_slice %46 {offsets = [0, 176], sizes = [5, 8], strides = [1, 1]} : vector<5x192xf32> to vector<5x8xf32>
    %cst_58 = arith.constant dense<0.000000e+00> : vector<5x5xf32>
    %146 = tpu.matmul %143, %144, %cst_58 {dimension_numbers = #tpu.dot_dimension_numbers<[1], [1], [0], [0], [0, 0, 1, 0], [], []>} : vector<5x8xf32>, vector<5x8xf32>, vector<5x5xf32> -> vector<5x5xf32>
    %cst_59 = arith.constant 1.250000e-01 : f32
    %147 = vector.broadcast %cst_59 : f32 to vector<5x5xf32>
    %148 = arith.mulf %146, %147 : vector<5x5xf32>
    %cst_60 = arith.constant dense<0xFF800000> : vector<5xf32>
    %149 = vector.multi_reduction <maximumf>, %148, %cst_60 [1] : vector<5x5xf32> to vector<5xf32>
    %150 = vector.shape_cast %149 : vector<5xf32> to vector<5x1xf32>
    %151 = vector.broadcast %150 : vector<5x1xf32> to vector<5x5xf32>
    %152 = arith.subf %148, %151 : vector<5x5xf32>
    %153 = math.exp %152 : vector<5x5xf32>
    %cst_61 = arith.constant dense<0.000000e+00> : vector<5xf32>
    %154 = vector.multi_reduction <add>, %153, %cst_61 [1] : vector<5x5xf32> to vector<5xf32>
    %155 = vector.shape_cast %154 : vector<5xf32> to vector<5x1xf32>
    %156 = vector.broadcast %155 : vector<5x1xf32> to vector<5x5xf32>
    %157 = arith.divf %153, %156 : vector<5x5xf32>
    %cst_62 = arith.constant dense<0.000000e+00> : vector<5x8xf32>
    %158 = tpu.matmul %157, %145, %cst_62 {dimension_numbers = #tpu.dot_dimension_numbers<[1], [0], [0], [1], [0, 0, 1, 1], [], []>} : vector<5x5xf32>, vector<5x8xf32>, vector<5x8xf32> -> vector<5x8xf32>
    %159 = vector.extract_strided_slice %46 {offsets = [0, 56], sizes = [5, 8], strides = [1, 1]} : vector<5x192xf32> to vector<5x8xf32>
    %160 = vector.extract_strided_slice %46 {offsets = [0, 120], sizes = [5, 8], strides = [1, 1]} : vector<5x192xf32> to vector<5x8xf32>
    %161 = vector.extract_strided_slice %46 {offsets = [0, 184], sizes = [5, 8], strides = [1, 1]} : vector<5x192xf32> to vector<5x8xf32>
    %cst_63 = arith.constant dense<0.000000e+00> : vector<5x5xf32>
    %162 = tpu.matmul %159, %160, %cst_63 {dimension_numbers = #tpu.dot_dimension_numbers<[1], [1], [0], [0], [0, 0, 1, 0], [], []>} : vector<5x8xf32>, vector<5x8xf32>, vector<5x5xf32> -> vector<5x5xf32>
    %cst_64 = arith.constant 1.250000e-01 : f32
    %163 = vector.broadcast %cst_64 : f32 to vector<5x5xf32>
    %164 = arith.mulf %162, %163 : vector<5x5xf32>
    %cst_65 = arith.constant dense<0xFF800000> : vector<5xf32>
    %165 = vector.multi_reduction <maximumf>, %164, %cst_65 [1] : vector<5x5xf32> to vector<5xf32>
    %166 = vector.shape_cast %165 : vector<5xf32> to vector<5x1xf32>
    %167 = vector.broadcast %166 : vector<5x1xf32> to vector<5x5xf32>
    %168 = arith.subf %164, %167 : vector<5x5xf32>
    %169 = math.exp %168 : vector<5x5xf32>
    %cst_66 = arith.constant dense<0.000000e+00> : vector<5xf32>
    %170 = vector.multi_reduction <add>, %169, %cst_66 [1] : vector<5x5xf32> to vector<5xf32>
    %171 = vector.shape_cast %170 : vector<5xf32> to vector<5x1xf32>
    %172 = vector.broadcast %171 : vector<5x1xf32> to vector<5x5xf32>
    %173 = arith.divf %169, %172 : vector<5x5xf32>
    %cst_67 = arith.constant dense<0.000000e+00> : vector<5x8xf32>
    %174 = tpu.matmul %173, %161, %cst_67 {dimension_numbers = #tpu.dot_dimension_numbers<[1], [0], [0], [1], [0, 0, 1, 1], [], []>} : vector<5x5xf32>, vector<5x8xf32>, vector<5x8xf32> -> vector<5x8xf32>
    %175 = tpu.concatenate %62, %78, %94, %110, %126, %142, %158, %174 in 1 : vector<5x8xf32>, vector<5x8xf32>, vector<5x8xf32>, vector<5x8xf32>, vector<5x8xf32>, vector<5x8xf32>, vector<5x8xf32>, vector<5x8xf32> -> vector<5x64xf32>
    %c0_68 = arith.constant 0 : index
    %c0_69 = arith.constant 0 : index
    %176 = vector.load %arg10[%c0_68, %c0_69] : memref<64x64xf32, #tpu.memory_space<vmem>>, vector<64x64xf32>
    %cst_70 = arith.constant dense<0.000000e+00> : vector<5x64xf32>
    %177 = tpu.matmul %175, %176, %cst_70 {dimension_numbers = #tpu.dot_dimension_numbers<[1], [0], [0], [1], [0, 0, 1, 1], [], []>} : vector<5x64xf32>, vector<64x64xf32>, vector<5x64xf32> -> vector<5x64xf32>
    %c0_71 = arith.constant 0 : index
    %c0_72 = arith.constant 0 : index
    %178 = vector.load %arg11[%c0_71, %c0_72] : memref<1x64xf32, #tpu.memory_space<vmem>>, vector<1x64xf32>
    %179 = vector.broadcast %178 : vector<1x64xf32> to vector<5x64xf32>
    %180 = arith.addf %177, %179 : vector<5x64xf32>
    %181 = arith.addf %19, %180 : vector<5x64xf32>
    %c0_73 = arith.constant 0 : index
    %c0_74 = arith.constant 0 : index
    %182 = vector.load %arg12[%c0_73, %c0_74] : memref<1x64xf32, #tpu.memory_space<vmem>>, vector<1x64xf32>
    %c0_75 = arith.constant 0 : index
    %c0_76 = arith.constant 0 : index
    %183 = vector.load %arg13[%c0_75, %c0_76] : memref<1x64xf32, #tpu.memory_space<vmem>>, vector<1x64xf32>
    %cst_77 = arith.constant dense<0.000000e+00> : vector<5xf32>
    %184 = vector.multi_reduction <add>, %181, %cst_77 [1] : vector<5x64xf32> to vector<5xf32>
    %185 = vector.shape_cast %184 : vector<5xf32> to vector<5x1xf32>
    %cst_78 = arith.constant 6.400000e+01 : f32
    %186 = vector.broadcast %cst_78 : f32 to vector<5x1xf32>
    %187 = arith.divf %185, %186 : vector<5x1xf32>
    %188 = vector.broadcast %187 : vector<5x1xf32> to vector<5x64xf32>
    %189 = arith.subf %181, %188 : vector<5x64xf32>
    %190 = arith.mulf %189, %189 : vector<5x64xf32>
    %cst_79 = arith.constant dense<0.000000e+00> : vector<5xf32>
    %191 = vector.multi_reduction <add>, %190, %cst_79 [1] : vector<5x64xf32> to vector<5xf32>
    %192 = vector.shape_cast %191 : vector<5xf32> to vector<5x1xf32>
    %cst_80 = arith.constant 6.400000e+01 : f32
    %193 = vector.broadcast %cst_80 : f32 to vector<5x1xf32>
    %194 = arith.divf %192, %193 : vector<5x1xf32>
    %cst_81 = arith.constant 9.99999974E-6 : f32
    %195 = vector.broadcast %cst_81 : f32 to vector<5x1xf32>
    %196 = arith.addf %194, %195 : vector<5x1xf32>
    %197 = math.rsqrt %196 : vector<5x1xf32>
    %198 = vector.broadcast %197 : vector<5x1xf32> to vector<5x64xf32>
    %199 = arith.mulf %189, %198 : vector<5x64xf32>
    %200 = vector.broadcast %182 : vector<1x64xf32> to vector<5x64xf32>
    %201 = arith.mulf %199, %200 : vector<5x64xf32>
    %202 = vector.broadcast %183 : vector<1x64xf32> to vector<5x64xf32>
    %203 = arith.addf %201, %202 : vector<5x64xf32>
    %c0_82 = arith.constant 0 : index
    %c0_83 = arith.constant 0 : index
    %204 = vector.load %arg14[%c0_82, %c0_83] : memref<64x128xf32, #tpu.memory_space<vmem>>, vector<64x128xf32>
    %cst_84 = arith.constant dense<0.000000e+00> : vector<5x128xf32>
    %205 = tpu.matmul %203, %204, %cst_84 {dimension_numbers = #tpu.dot_dimension_numbers<[1], [0], [0], [1], [0, 0, 1, 1], [], []>} : vector<5x64xf32>, vector<64x128xf32>, vector<5x128xf32> -> vector<5x128xf32>
    %c0_85 = arith.constant 0 : index
    %c0_86 = arith.constant 0 : index
    %206 = vector.load %arg15[%c0_85, %c0_86] : memref<1x128xf32, #tpu.memory_space<vmem>>, vector<1x128xf32>
    %207 = vector.broadcast %206 : vector<1x128xf32> to vector<5x128xf32>
    %208 = arith.addf %205, %207 : vector<5x128xf32>
    %cst_87 = arith.constant 5.000000e-01 : f32
    %209 = vector.broadcast %cst_87 : f32 to vector<5x128xf32>
    %210 = arith.mulf %209, %208 : vector<5x128xf32>
    %cst_88 = arith.constant 0.707106769 : f32
    %211 = vector.broadcast %cst_88 : f32 to vector<5x128xf32>
    %212 = arith.mulf %208, %211 : vector<5x128xf32>
    %213 = math.erf %212 : vector<5x128xf32>
    %cst_89 = arith.constant 1.000000e+00 : f32
    %214 = vector.broadcast %cst_89 : f32 to vector<5x128xf32>
    %215 = arith.addf %214, %213 : vector<5x128xf32>
    %216 = arith.mulf %210, %215 : vector<5x128xf32>
    %c0_90 = arith.constant 0 : index
    %c0_91 = arith.constant 0 : index
    %217 = vector.load %arg16[%c0_90, %c0_91] : memref<128x64xf32, #tpu.memory_space<vmem>>, vector<128x64xf32>
    %cst_92 = arith.constant dense<0.000000e+00> : vector<5x64xf32>
    %218 = tpu.matmul %216, %217, %cst_92 {dimension_numbers = #tpu.dot_dimension_numbers<[1], [0], [0], [1], [0, 0, 1, 1], [], []>} : vector<5x128xf32>, vector<128x64xf32>, vector<5x64xf32> -> vector<5x64xf32>
    %c0_93 = arith.constant 0 : index
    %c0_94 = arith.constant 0 : index
    %219 = vector.load %arg17[%c0_93, %c0_94] : memref<1x64xf32, #tpu.memory_space<vmem>>, vector<1x64xf32>
    %220 = vector.broadcast %219 : vector<1x64xf32> to vector<5x64xf32>
    %221 = arith.addf %218, %220 : vector<5x64xf32>
    %222 = arith.addf %181, %221 : vector<5x64xf32>
    %223 = vector.extract_strided_slice %222 {offsets = [0, 0], sizes = [1, 64], strides = [1, 1]} : vector<5x64xf32> to vector<1x64xf32>
    %c0_95 = arith.constant 0 : index
    %c0_96 = arith.constant 0 : index
    %224 = vector.load %arg18[%c0_95, %c0_96] : memref<64x128xf32, #tpu.memory_space<vmem>>, vector<64x128xf32>
    %cst_97 = arith.constant dense<0.000000e+00> : vector<1x128xf32>
    %225 = tpu.matmul %223, %224, %cst_97 {dimension_numbers = #tpu.dot_dimension_numbers<[1], [0], [0], [1], [0, 0, 1, 1], [], []>} : vector<1x64xf32>, vector<64x128xf32>, vector<1x128xf32> -> vector<1x128xf32>
    %c0_98 = arith.constant 0 : index
    %c0_99 = arith.constant 0 : index
    %226 = vector.load %arg19[%c0_98, %c0_99] : memref<1x128xf32, #tpu.memory_space<vmem>>, vector<1x128xf32>
    %227 = arith.addf %225, %226 : vector<1x128xf32>
    %228 = vector.shape_cast %227 : vector<1x128xf32> to vector<1x128xf32>
    %229 = vector.broadcast %228 : vector<1x128xf32> to vector<8x128xf32>
    %c0_100 = arith.constant 0 : index
    %c0_101 = arith.constant 0 : index
    %c0_102 = arith.constant 0 : index
    %230 = vector.load %arg20[%c0_100, %c0_101, %c0_102] : memref<1x8x128xf32, #tpu.memory_space<vmem>>, vector<1x8x128xf32>
    %231 = vector.shape_cast %230 : vector<1x8x128xf32> to vector<8x128xf32>
    %232 = vector.shape_cast %229 : vector<8x128xf32> to vector<1x8x128xf32>
    tpu.vector_store %arg20[%c0_100, %c0_101, %c0_102], %232 {strides = array<i32>} : memref<1x8x128xf32, #tpu.memory_space<vmem>>, vector<1x8x128xf32>,
    return
  }
  func.func @transform_0(%arg0: i32) -> (i32, i32, i32) {
    %c0_i32 = arith.constant 0 : i32
    %c0_i32_0 = arith.constant 0 : i32
    %c0_i32_1 = arith.constant 0 : i32
    return %arg0, %c0_i32, %c0_i32_0 : i32, i32, i32
  }
  func.func @transform_1(%arg0: i32) -> (i32, i32) {
    %c0_i32 = arith.constant 0 : i32
    %c0_i32_0 = arith.constant 0 : i32
    %c0_i32_1 = arith.constant 0 : i32
    return %c0_i32, %c0_i32_0 : i32, i32
  }
  func.func @transform_2(%arg0: i32) -> (i32, i32) {
    %c0_i32 = arith.constant 0 : i32
    %c0_i32_0 = arith.constant 0 : i32
    %c0_i32_1 = arith.constant 0 : i32
    return %c0_i32, %c0_i32_0 : i32, i32
  }
  func.func @transform_3(%arg0: i32) -> (i32, i32) {
    %c0_i32 = arith.constant 0 : i32
    %c0_i32_0 = arith.constant 0 : i32
    %c0_i32_1 = arith.constant 0 : i32
    return %c0_i32, %c0_i32_0 : i32, i32
  }
  func.func @transform_4(%arg0: i32) -> (i32, i32) {
    %c0_i32 = arith.constant 0 : i32
    %c0_i32_0 = arith.constant 0 : i32
    %c0_i32_1 = arith.constant 0 : i32
    return %c0_i32, %c0_i32_0 : i32, i32
  }
  func.func @transform_5(%arg0: i32) -> (i32, i32) {
    %c0_i32 = arith.constant 0 : i32
    %c0_i32_0 = arith.constant 0 : i32
    %c0_i32_1 = arith.constant 0 : i32
    return %c0_i32, %c0_i32_0 : i32, i32
  }
  func.func @transform_6(%arg0: i32) -> (i32, i32) {
    %c0_i32 = arith.constant 0 : i32
    %c0_i32_0 = arith.constant 0 : i32
    %c0_i32_1 = arith.constant 0 : i32
    return %c0_i32, %c0_i32_0 : i32, i32
  }
  func.func @transform_7(%arg0: i32) -> (i32, i32) {
    %c0_i32 = arith.constant 0 : i32
    %c0_i32_0 = arith.constant 0 : i32
    %c0_i32_1 = arith.constant 0 : i32
    return %c0_i32, %c0_i32_0 : i32, i32
  }
  func.func @transform_8(%arg0: i32) -> (i32, i32) {
    %c0_i32 = arith.constant 0 : i32
    %c0_i32_0 = arith.constant 0 : i32
    %c0_i32_1 = arith.constant 0 : i32
    return %c0_i32, %c0_i32_0 : i32, i32
  }
  func.func @transform_9(%arg0: i32) -> (i32, i32) {
    %c0_i32 = arith.constant 0 : i32
    %c0_i32_0 = arith.constant 0 : i32
    %c0_i32_1 = arith.constant 0 : i32
    return %c0_i32, %c0_i32_0 : i32, i32
  }
  func.func @transform_10(%arg0: i32) -> (i32, i32) {
    %c0_i32 = arith.constant 0 : i32
    %c0_i32_0 = arith.constant 0 : i32
    %c0_i32_1 = arith.constant 0 : i32
    return %c0_i32, %c0_i32_0 : i32, i32
  }
  func.func @transform_11(%arg0: i32) -> (i32, i32) {
    %c0_i32 = arith.constant 0 : i32
    %c0_i32_0 = arith.constant 0 : i32
    %c0_i32_1 = arith.constant 0 : i32
    return %c0_i32, %c0_i32_0 : i32, i32
  }
  func.func @transform_12(%arg0: i32) -> (i32, i32) {
    %c0_i32 = arith.constant 0 : i32
    %c0_i32_0 = arith.constant 0 : i32
    %c0_i32_1 = arith.constant 0 : i32
    return %c0_i32, %c0_i32_0 : i32, i32
  }
  func.func @transform_13(%arg0: i32) -> (i32, i32) {
    %c0_i32 = arith.constant 0 : i32
    %c0_i32_0 = arith.constant 0 : i32
    %c0_i32_1 = arith.constant 0 : i32
    return %c0_i32, %c0_i32_0 : i32, i32
  }
  func.func @transform_14(%arg0: i32) -> (i32, i32) {
    %c0_i32 = arith.constant 0 : i32
    %c0_i32_0 = arith.constant 0 : i32
    %c0_i32_1 = arith.constant 0 : i32
    return %c0_i32, %c0_i32_0 : i32, i32
  }
  func.func @transform_15(%arg0: i32) -> (i32, i32) {
    %c0_i32 = arith.constant 0 : i32
    %c0_i32_0 = arith.constant 0 : i32
    %c0_i32_1 = arith.constant 0 : i32
    return %c0_i32, %c0_i32_0 : i32, i32
  }
  func.func @transform_16(%arg0: i32) -> (i32, i32) {
    %c0_i32 = arith.constant 0 : i32
    %c0_i32_0 = arith.constant 0 : i32
    %c0_i32_1 = arith.constant 0 : i32
    return %c0_i32, %c0_i32_0 : i32, i32
  }
  func.func @transform_17(%arg0: i32) -> (i32, i32) {
    %c0_i32 = arith.constant 0 : i32
    %c0_i32_0 = arith.constant 0 : i32
    %c0_i32_1 = arith.constant 0 : i32
    return %c0_i32, %c0_i32_0 : i32, i32
  }
  func.func @transform_18(%arg0: i32) -> (i32, i32) {
    %c0_i32 = arith.constant 0 : i32
    %c0_i32_0 = arith.constant 0 : i32
    %c0_i32_1 = arith.constant 0 : i32
    return %c0_i32, %c0_i32_0 : i32, i32
  }
  func.func @transform_19(%arg0: i32) -> (i32, i32, i32) {
    %c0_i32 = arith.constant 0 : i32
    %c0_i32_0 = arith.constant 0 : i32
    %c0_i32_1 = arith.constant 0 : i32
    return %arg0, %c0_i32, %c0_i32_0 : i32, i32, i32
  }
}

</mosaic_0001>

<bundles_post_ra>
// kernel: ssftt_forward.1
= control target key start
LH: loop header
LB: loop body
LE: loop exit
PB: predicated region body
PF: predicated region fallthrough
CT: control target
= control target key end

     0   :  { %s3980_s0 = inlined_call_operand.vmem [shape: f32[2,25,64], index: 0, kind: input, shape index: {}]   ;;  %s3981_s1 = inlined_call_operand.vmem [shape: f32[4,64], index: 1, kind: input, shape index: {}]   ;;  %s3982_s2 = inlined_call_operand.vmem [shape: f32[64,64], index: 2, kind: input, shape index: {}]   ;;  %s3983_s3 = inlined_call_operand.vmem [shape: f32[1,64], index: 3, kind: input, shape index: {}]   ;;  %s3984_s4 = inlined_call_operand.vmem [shape: f32[5,64], index: 4, kind: input, shape index: {}]   ;;  %s3985_s5 = inlined_call_operand.vmem [shape: f32[1,64], index: 5, kind: input, shape index: {}]   ;;  %s3986_s6 = inlined_call_operand.vmem [shape: f32[1,64], index: 6, kind: input, shape index: {}]   ;;  %s3987_s7 = inlined_call_operand.vmem [shape: f32[64,192], index: 7, kind: input, shape index: {}]   ;;  %s3988_s8 = inlined_call_operand.vmem [shape: f32[1,192], index: 8, kind: input, shape index: {}]   ;;  %s3989_s9 = inlined_call_operand.vmem [shape: f32[64,64], index: 9, kind: input, shape index: {}]   ;;  %s3990_s10 = inlined_call_operand.vmem [shape: f32[1,64], index: 10, kind: input, shape index: {}]   ;;  %s3991_s11 = inlined_call_operand.vmem [shape: f32[1,64], index: 11, kind: input, shape index: {}]   ;;  %s3992_s12 = inlined_call_operand.vmem [shape: f32[1,64], index: 12, kind: input, shape index: {}]   ;;  %s3993_s13 = inlined_call_operand.vmem [shape: f32[64,128], index: 13, kind: input, shape index: {}]   ;;  %s3994_s14 = inlined_call_operand.vmem [shape: f32[1,128], index: 14, kind: input, shape index: {}]   ;;  %s3995_s15 = inlined_call_operand.vmem [shape: f32[128,64], index: 15, kind: input, shape index: {}]   ;;  %s3996_s16 = inlined_call_operand.vmem [shape: f32[1,64], index: 16, kind: input, shape index: {}]   ;;  %s3997_s17 = inlined_call_operand.vmem [shape: f32[64,128], index: 17, kind: input, shape index: {}]   ;;  %s3998_s18 = inlined_call_operand.vmem [shape: f32[1,128], index: 18, kind: input, shape index: {}]   ;;  %s3999_s19 = inlined_call_operand.vmem [shape: f32[2,8,128], index: 19, kind: output, shape index: {}]  }
   0x1   :  { %4003 = sst [smem:[#allocation2_spill]] %s3980_s0  ;;  %s3521_s0 = smov 0  }
   0x2   :  { %4004 = sst [smem:[#allocation3_spill]] %s3981_s1 }
   0x3   :  { %4005 = sst [smem:[#allocation4_spill]] %s3982_s2 }
   0x4   :  { %4006 = sst [smem:[#allocation5_spill]] %s3983_s3 }
   0x5 LB: > { %s2839_s30 = sadd.s32 4294967295, %s3400_s0   ;;  %p2843_p0 = scmp.ge.s32.totalorder %s3400_s0, 1  ;;  %s3400_s0 = sphi %s3521_s0, %s29_s0  }
   0x6   : > { %p537_p1 = scmp.lt.s32.totalorder %s3400_s0, 3 }
   0x8   : > { %p538_p2 = pnand %p2843_p0, %p537_p1 }
   0x9   : > { %p592_p3 = scmp.lt.s32.totalorder (!%p538_p2), %s2839_s30, 1  ;;  %v3402_v0 = vmov (!%p538_p2), 0.0|0.0   ;;  %vm3403_vm0 = vmmov (!%p538_p2), 0   ;;  %v3404_v1 = vmov (!%p538_p2), 0.0   ;;  %vm606_vm1 = vcmask (!%p538_p2), 523264   ;;  %s4007_s22 = sld [smem:[#allocation2_spill]] (!%p538_p2) }
   0xa   : > { %541 = sbr.rel (%p538_p2) target bundleno = 4076 (0xfec), region = 96  ;;  %3218 = vmatprep.subr.bf16.mxu0 (!%p538_p2), %v3402_v0  ;;  %3010 = vmatprep.mubr.msk.f32.mxu0 (!%p538_p2), %vm3403_vm0, %v3404_v1  ;;  %vm3220_vm2 = vmpackc.low (!%p538_p2), %vm606_vm1, %vm606_vm1  ;;  %s4008_s25 = sld [smem:[#allocation3_spill]] (!%p538_p2)  ;;  %vm692_vm3 = vcmask (!%p538_p2), 199680   ;;  %vm801_vm4 = vcmask (!%p538_p2), 1040384   ;;  %vm3405_vm5 = vmmov (!%p538_p2), 1   ;;  %vm797_vm7 = vcmask (!%p538_p2), 203776  }
   0xb   : > { %s4009_s27 = sld [smem:[#allocation4_spill]] (!%p538_p2)  ;;  %vm3247_vm6 = vmpackc.low (!%p538_p2), %vm801_vm4, %vm3405_vm5  ;;  %s4010_s1 = sld [smem:[#allocation5_spill]] (!%p538_p2)  ;;  %v880_v42 = vld [vmem:[%s3984_s4] sm:$0x1f] (!%p538_p2)  ;;  %vm884_vm8 = vcmask (!%p538_p2), 520192   ;;  %v914_v51 = vld [vmem:[%s3987_s7 + $0x8] sm:$0xff] (!%p538_p2) }
   0xc   : > { %v916_v52 = vld [vmem:[%s3987_s7 + $0x18] sm:$0xff] (!%p538_p2)  ;;  %v913_v54 = vld [vmem:[%s3987_s7] sm:$0xff] (!%p538_p2)  ;;  %v915_v55 = vld [vmem:[%s3987_s7 + $0x10] sm:$0xff] (!%p538_p2)  ;;  %s3407_s3 = smov (!%p538_p2), 120   ;;  %s3408_s26 = smov (!%p538_p2), 112   ;;  %vm1018_vm9 = vcmask (!%p538_p2), 64512  }
   0xd   : > { %v3249_v53 = vpack.c.bf16 (!%p538_p2), %v916_v52, %v914_v51  ;;  %v3251_v56 = vpack.c.bf16 (!%p538_p2), %v915_v55, %v913_v54  ;;  %v918_v57 = vld [vmem:[%s3987_s7 + $0x28] sm:$0xff] (!%p538_p2)  ;;  %v920_v58 = vld [vmem:[%s3987_s7 + $0x38] sm:$0xff] (!%p538_p2)  ;;  %v917_v60 = vld [vmem:[%s3987_s7 + $0x20] sm:$0xff] (!%p538_p2)  ;;  %s3409_s28 = smov (!%p538_p2), 104   ;;  %s3410_s29 = smov (!%p538_p2), 96   ;;  %vm1110_vm10 = vcmask (!%p538_p2), 1044480  }
   0xe   : > { %v3253_v59 = vpack.c.bf16 (!%p538_p2), %v920_v58, %v918_v57  ;;  %v919_v61 = vld [vmem:[%s3987_s7 + $0x30] sm:$0xff] (!%p538_p2)  ;;  %v922_v63 = vld [vmem:[%s3987_s7 + $0x48] sm:$0xff] (!%p538_p2)  ;;  %s3412_s21 = smov (!%p538_p2), 80   ;;  %vm1094_vm11 = vcmask (!%p538_p2), 36864   ;;  %s3416_s23 = smov (!%p538_p2), 40   ;;  %vm1106_vm12 = vcmask (!%p538_p2), 39936  }
   0xf   : > { %v3255_v62 = vpack.c.bf16 (!%p538_p2), %v919_v61, %v917_v60  ;;  %s3417_s24 = smov (!%p538_p2), 32   ;;  %vm2382_vm13 = vcmask (!%p538_p2), 130048   ;;  %vm2384_vm14 = vcmask (!%p538_p2), 195584   ;;  %vm2386_vm15 = vcmask (!%p538_p2), 261120  }
  0x10   : > { %v605_v8 = vld [vmem:[%s4008_s25] sm:$0xf] (!%p538_p2)  ;;  %s3406_s25 = smov (!%p538_p2), 64  }
  0x11   : > { %s4014_s30 = smov (!%p592_p3, %s2839_s30), 1  ;;  %v704_v9 = vld [vmem:[%s4009_s27] sm:$0xff]  ;;  %v705_v10 = vld [vmem:[%s4009_s27 + $0x8] sm:$0xff]  ;;  %v706_v11 = vld [vmem:[%s4009_s27 + $0x10] sm:$0xff] }
  0x12   : > { %s2903_s20 = sshll.u32 %s4014_s30, 5  ;;  %v3226_v12 = vpack.c.bf16 %v705_v10, %v704_v9  ;;  %v707_v13 = vld [vmem:[%s4009_s27 + $0x18] sm:$0xff]  ;;  %v708_v15 = vld [vmem:[%s4009_s27 + $0x20] sm:$0xff]  ;;  %v709_v16 = vld [vmem:[%s4009_s27 + $0x28] sm:$0xff] }
  0x13   : > { %s596_s2 = scalar_lea.vmem %s4007_s22, %s2903_s20  ;;  %v3230_v14 = vpack.c.bf16 %v707_v13, %v706_v11  ;;  %v3234_v17 = vpack.c.bf16 %v709_v16, %v708_v15  ;;  %v710_v18 = vld [vmem:[%s4009_s27 + $0x30] sm:$0xff]  ;;  %v711_v19 = vld [vmem:[%s4009_s27 + $0x38] sm:$0xff]  ;;  %v875_v39 = vld [vmem:[%s4010_s1] sm:$0x1]  ;;  %s3411_s20 = smov 88  }
  0x14   : > { %v601_v2 = vld [vmem:[%s596_s2] sm:$0xff]  ;;  %v602_v3 = vld [vmem:[%s596_s2 + $0x8] sm:$0xff]  ;;  %v603_v5 = vld [vmem:[%s596_s2 + $0x10] sm:$0xff]  ;;  %3227 = vmatprep.subr.bf16.mxu1 %v3226_v12  ;;  %v3238_v20 = vpack.c.bf16 %v711_v19, %v710_v18  ;;  %s3413_s1 = smov 72   ;;  %s4001_s22 = smov 56  }
  0x15   : > { %v3219_v4 = vpack.c.bf16 %v602_v3, %v601_v2  ;;  %3029 = vmatprep.mubr.msk.f32.mxu1 %vm606_vm1, %v601_v2  ;;  %v604_v6 = vld [vmem:[%s596_s2 + $0x18] sm:$0x1]  ;;  %3229 = vmatpush3.bf16.msra.mxu1 %v3226_v12  ;;  %v925_v10 = vld [vmem:[%s3987_s7 + $0x60] sm:$0xff]  ;;  %v927_v11 = vld [vmem:[%s3987_s7 + $0x70] sm:$0xff]  ;;  %s4002_s2 = smov 48  }
  0x16   : > { %v3223_v7 = vpack.c.bf16 %v604_v6, %v603_v5  ;;  %3231 = vmatprep.subr.bf16.mxu1 %v3230_v14  ;;  %v924_v2 = vld [vmem:[%s3987_s7 + $0x58] sm:$0xff]  ;;  %v3263_v12 = vpack.c.bf16 %v927_v11, %v925_v10  ;;  %v2859_v19 = vld [vmem:[%s3986_s6] ss:$0 sm:$0xff] }
  0x17   : > { %3221 = vmatpush3.bf16.xpose.msk.msra.mxu0 %vm3220_vm2, %v3219_v4  ;;  %v921_v4 = vld [vmem:[%s3987_s7 + $0x40] sm:$0xff] }
  0x18   : > { %3222 = vmatprep.subr.bf16.mxu0 %v3402_v0 }
  0x19   : > { %3233 = vmatpush3.bf16.msra.mxu1 %v3230_v14 }
  0x1a   : > { %3235 = vmatprep.subr.bf16.mxu1 %v3234_v17 }
  0x1d   : > { %3237 = vmatpush3.bf16.msra.mxu1 %v3234_v17  ;;  %v2858_v17 = vld [vmem:[%s3985_s5] ss:$0 sm:$0xff] }
  0x1e   : > { %3239 = vmatprep.subr.bf16.mxu1 %v3238_v20 }
  0x1f   : > { %3225 = vmatpush3.bf16.xpose.msk.msra.mxu0 %vm3220_vm2, %v3223_v7  ;;  %v926_v7 = vld [vmem:[%s3987_s7 + $0x68] sm:$0xff]  ;;  %vm2388_vm2 = vcmask 326656  }
  0x20   : > { %3046 = vmatprep.subr.mxu0 %v3404_v1 }
  0x21   : > { %3241 = vmatpush3.bf16.msra.mxu1 %v3238_v20 }
  0x22   : > { %3242 = vmatprep.subr.bf16.mxu1 %v3402_v0 }
  0x24   : > { %3030 = vmatmul.mubr.msk.f32.vlgmr.msra.gmra.mrb[0].mxu1 %vm606_vm1, %v602_v3  ;;  %v3257_v3 = vpack.c.bf16 %v924_v2, %v922_v63 }
  0x25   : > { %3032 = vmatprep.mubr.msk.f32.mxu1 %vm606_vm1, %v603_v5  ;;  %v923_v5 = vld [vmem:[%s3987_s7 + $0x50] sm:$0xff] }
  0x26   : > { %3011 = vmatmul.mubr.msk.f32.vlgmr.msra.gmra.mrb[0].mxu0 %vm606_vm1, %v605_v8  ;;  %v928_v8 = vld [vmem:[%s3987_s7 + $0x78] sm:$0xff] }
  0x27   : > { %3048 = vmatprep.mubr.msk.f32.mxu0 %vm3403_vm0, %v3404_v1  ;;  %v3261_v9 = vpack.c.bf16 %v928_v8, %v926_v7 }
  0x28   : > { %3033 = vmatmul.mubr.msk.f32.gmra.mrb[2].mxu1 %vm606_vm1, %v604_v6  ;;  %v3259_v6 = vpack.c.bf16 %v923_v5, %v921_v4 }
  0x29   : > { %3043 = vmatprep.mubr.msk.f32.mxu1 %vm3403_vm0, %v3404_v1 }
  0xf7   : > { %v3031_v29 = vpop.f32.mrb[0].mxu1 }
  0xf8   : > { %v778_v30 = vpop.f32.mrb[1].mxu1 }
  0xf9   : > { %v688_v21 = vpop.f32.mrb[0].mxu0  ;;  %v3243_v31 = vpack.c.bf16 %v3031_v29, %v778_v30 }
  0xfa   : > { %v3012_v22 = vpop.f32.mrb[1].mxu0  ;;  %v693_v23 = vsel %vm692_vm3, %v688_v21, -inf }
  0xfb   : > { %694 = vmax.xlane.f32.xlu0 %v693_v23  ;;  %v3034_v32 = vpop.f32.mrb[2].mxu1  ;;  %3244 = vmatpush3.bf16.msra.mxu1 %v3243_v31  ;;  %v931_v22 = vlaneseq }
  0xfc   : > { %v788_v33 = vpop.f32.mrb[3].mxu1  ;;  %3245 = vmatprep.subr.bf16.mxu1 %v3402_v0 }
  0xfd   : > { %v3246_v34 = vpack.c.bf16 %v3034_v32, %v788_v33  ;;  %v3653_v23 = vshrl.u32 %v931_v22, 7 }
  0xff   : > { %3248 = vmatpush3.bf16.msk.msra.mxu1 %vm3247_vm6, %v3246_v34  ;;  %v937_v30 = vsub.s32 1, %v3653_v23 }
 0x100   : > { %3250 = vmatprep.subr.bf16.mxu1 %v3249_v53 }
 0x188   : > { %v695_v24 = vpop.xlane.xlu0 %694 }
 0x189   : > { %v696_v25 = vsub.f32 %v688_v21, %v695_v24  ;;  %v933_v24 = vsub.s32 0, %v3653_v23 }
 0x18b   : > { %v697_v26 = vmul.f32 1.442695, %v696_v25  ;;  %v929_v25 = vld [vmem:[%s3988_s8] sm:$0x3] }
 0x18c   : > { %v938_v31 = vrot.slane %v929_v25, %v937_v30 }
 0x18d   : > { %3352 = vpow2.f32 %v697_v26  ;;  %v934_v26 = vrot.slane %v929_v25, %v933_v24 }
 0x197   : > { %v3353_v27 = vpop.eup %3352 }
 0x198   : > { %v699_v28 = vsel %vm692_vm3, %v3353_v27, 0.0  ;;  %vm2390_vm3 = vcmask 392192  }
 0x199   : > { %700 = vadd.xlane.f32.xlu0 %v699_v28 }
 0x226   : > { %v701_v35 = vpop.xlane.xlu0 %700 }
 0x227   : > { %3354 = vrcp.f32 %v701_v35 }
 0x231   : > { %v3355_v36 = vpop.eup %3354 }
 0x232   : > { %v703_v37 = vmul.f32 %v3355_v36, %v3353_v27 }
 0x234   : > { %3044 = vmatmul.mubr.msk.f32.vlgmr.msra.gmra.mrb[4].mxu1 %vm797_vm7, %v703_v37 }
 0x235   : > { %1008 = vmatprep.mubr.f32.mxu1 %v3404_v1  ;;  %3252 = vmatpush1.bf16.msra.mxu1 %v3251_v56 }
 0x236   : > { %3254 = vmatprep.subr.bf16.mxu1 %v3253_v59 }
 0x239   : > { %3256 = vmatpush1.bf16.msra.mxu1 %v3255_v62 }
 0x23a   : > { %3258 = vmatprep.subr.bf16.mxu1 %v3257_v3 }
 0x23d   : > { %3260 = vmatpush1.bf16.msra.mxu1 %v3259_v6 }
 0x23e   : > { %3262 = vmatprep.subr.bf16.mxu1 %v3261_v9 }
 0x241   : > { %3264 = vmatpush1.bf16.msra.mxu1 %v3263_v12 }
 0x242   : > { %3061 = vmatprep.subr.mxu1 %v3404_v1 }
 0x307   : > { %v871_v38 = vpop.f32.mrb[4].mxu1 }
 0x308   : > { %v877_v40 = vrot.slane %v871_v38, 7  ;;  %v3045_v41 = vpop.f32.mrb[5].mxu1 }
 0x30a   : > { %v879_v43 = vsel %vm801_vm4, %v875_v39, %v877_v40  ;;  %vm2392_vm4 = vcmask 457728  }
 0x30b   : > { %v3589_v44 = vadd.f32 %v880_v42, %v879_v43 }
 0x30d   : > { %v885_v45 = vsel %vm884_vm8, %v3589_v44, 0.0 }
 0x30e   : > { %886 = vadd.xlane.f32.xlu1 %v885_v45 }
 0x39b   : > { %v887_v46 = vpop.xlane.xlu1 %886 }
 0x39c   : > { %v889_v47 = vmul.f32 0.015625, %v887_v46 }
 0x39e   : > { %v890_v48 = vsub.f32 %v3589_v44, %v889_v47 }
 0x3a0   : > { %v891_v49 = vmul.f32 %v890_v48, %v890_v48 }
 0x3a2   : > { %v892_v50 = vsel %vm884_vm8, %v891_v49, 0.0 }
 0x3a3   : > { %893 = vadd.xlane.f32.xlu1 %v892_v50 }
 0x430   : > { %v894_v13 = vpop.xlane.xlu1 %893 }
 0x431   : > { %v895_v14 = vmul.f32 0.015625, %v894_v13 }
 0x433   : > { %v896_v15 = vadd.f32 1e-05, %v895_v14 }
 0x435   : > { %3356 = vrsqrt.f32 %v896_v15 }
 0x43f   : > { %v3357_v16 = vpop.eup %3356 }
 0x440   : > { %v898_v18 = vmul.f32 %v3357_v16, %v890_v48 }
 0x442   : > { %v905_v20 = vmul.f32 %v2858_v17, %v898_v18 }
 0x444   : > { %v912_v21 = vadd.f32 %v2859_v19, %v905_v20 }
 0x446   : > { %2860 = vmatmul.mubr.msk.f32.vlgmr.msra.gmra.mrb[6].mxu1 %vm606_vm1, %v912_v21 }
 0x447   : > { %3063 = vmatprep.mubr.msk.f32.mxu1 %vm3403_vm0, %v3404_v1 }
 0x519   : > { %v1010_v27 = vpop.f32.mrb[6].mxu1 }
 0x51a   : > { %v1011_v28 = vadd.f32 %v1010_v27, %v934_v26  ;;  %v1012_v29 = vpop.f32.mrb[7].mxu1 }
 0x51b   : > { %v3671_v33 = vadd.f32 %v1012_v29, %v938_v31 }
 0x51c   : > { %1016 = vrot.lane.b32.xlu0 %v1011_v28, %s3406_s25  ;;  %s3418_s25 = smov 24  }
 0x520   : > { %1184 = vrot.lane.b32.xlu0 %v1011_v28, %s3407_s3 }
 0x524   : > { %1351 = vrot.lane.b32.xlu0 %v1011_v28, %s3408_s26 }
 0x528   : > { %1518 = vrot.lane.b32.xlu0 %v1011_v28, %s3409_s28 }
 0x52c   : > { %1685 = vrot.lane.b32.xlu0 %v1011_v28, %s3410_s29 }
 0x530   : > { %1852 = vrot.lane.b32.xlu0 %v1011_v28, %s3411_s20 }
 0x534   : > { %2019 = vrot.lane.b32.xlu0 %v1011_v28, %s3412_s21 }
 0x538   : > { %2186 = vrot.lane.b32.xlu0 %v1011_v28, %s3413_s1 }
 0x58e   : > { %v1017_v32 = vpop.permute.xlu0 %1016 }
 0x58f   : > { %3047 = vmatpush3.xpose.msk.msra.mxu0 %vm1018_vm9, %v1017_v32 }
 0x590   : > { %3051 = vmatprep.subr.mxu0 %v3404_v1 }
 0x592   : > { %3049 = vmatmul.mubr.msk.f32.vlgmr.msra.gmra.mrb[2].mxu0 %vm1018_vm9, %v1011_v28  ;;  %v1185_v47 = vpop.permute.xlu0 %1184 }
 0x593   : > { %3052 = vmatpush3.msk.msra.mxu0 %vm1110_vm10, %v3671_v33  ;;  %3053 = vmatprep.mubr.msk.f32.mxu0 %vm3403_vm0, %v3404_v1 }
 0x594   : > { %3056 = vmatprep.subr.mxu0 %v3404_v1 }
 0x596   : > { %v1352_v49 = vpop.permute.xlu0 %1351 }
 0x59a   : > { %v1519_v52 = vpop.permute.xlu0 %1518 }
 0x59e   : > { %v1686_v54 = vpop.permute.xlu0 %1685 }
 0x5a2   : > { %v1853_v56 = vpop.permute.xlu0 %1852 }
 0x5a6   : > { %v2020_v58 = vpop.permute.xlu0 %2019 }
 0x5aa   : > { %v2187_v60 = vpop.permute.xlu0 %2186 }
 0x665   : > { %v1089_v34 = vpop.f32.mrb[2].mxu0 }
 0x666   : > { %v1093_v35 = vmul.f32 0.125, %v1089_v34  ;;  %v3050_v36 = vpop.f32.mrb[3].mxu0 }
 0x668   : > { %v1095_v37 = vsel %vm1094_vm11, %v1093_v35, -inf }
 0x669   : > { %1096 = vmax.xlane.f32.xlu1 %v1095_v37 }
 0x67a   : > { %1186 = vrot.lane.b32.xlu1 %v1011_v28, %s4001_s22  ;;  %s3419_s22 = smov 16  }
 0x67e   : > { %1353 = vrot.lane.b32.xlu1 %v1011_v28, %s4002_s2  ;;  %s3420_s2 = smov 8  }
 0x6f6   : > { %v1097_v38 = vpop.xlane.xlu1 %1096 }
 0x6f7   : > { %v1098_v39 = vsub.f32 %v1093_v35, %v1097_v38 }
 0x6f9   : > { %v1099_v40 = vmul.f32 1.442695, %v1098_v39 }
 0x6fa   : > { %v1187_v43 = vpop.permute.xlu1 %1186 }
 0x6fb   : > { %3358 = vpow2.f32 %v1099_v40 }
 0x6fe   : > { %v1354_v45 = vpop.permute.xlu1 %1353 }
 0x705   : > { %v3359_v41 = vpop.eup %3358 }
 0x706   : > { %v1101_v42 = vsel %vm1094_vm11, %v3359_v41, 0.0 }
 0x707   : > { %1102 = vadd.xlane.f32.xlu1 %v1101_v42 }
 0x718   : > { %1520 = vrot.lane.b32.xlu1 %v1011_v28, %s3416_s23 }
 0x71c   : > { %1687 = vrot.lane.b32.xlu1 %v1011_v28, %s3417_s24 }
 0x720   : > { %1854 = vrot.lane.b32.xlu1 %v1011_v28, %s3418_s25 }
 0x724   : > { %2021 = vrot.lane.b32.xlu1 %v1011_v28, %s3419_s22 }
 0x728   : > { %2188 = vrot.lane.b32.xlu1 %v1011_v28, %s3420_s2 }
 0x794   : > { %v1103_v46 = vpop.xlane.xlu1 %1102 }
 0x795   : > { %3360 = vrcp.f32 %v1103_v46 }
 0x798   : > { %v1521_v51 = vpop.permute.xlu1 %1520 }
 0x79c   : > { %v1688_v53 = vpop.permute.xlu1 %1687 }
 0x79f   : > { %v3361_v48 = vpop.eup %3360 }
 0x7a0   : > { %v1105_v50 = vmul.f32 %v3361_v48, %v3359_v41  ;;  %v1855_v55 = vpop.permute.xlu1 %1854 }
 0x7a2   : > { %3054 = vmatmul.mubr.msk.f32.vlgmr.msra.gmra.mrb[4].mxu0 %vm1106_vm12, %v1105_v50 }
 0x7a3   : > { %3057 = vmatpush3.xpose.msk.msra.mxu0 %vm1018_vm9, %v1187_v43  ;;  %3058 = vmatprep.mubr.msk.f32.mxu0 %vm3403_vm0, %v3404_v1 }
 0x7a4   : > { %3066 = vmatprep.subr.mxu0 %v3404_v1  ;;  %v2022_v57 = vpop.permute.xlu1 %2021 }
 0x7a6   : > { %3059 = vmatmul.mubr.msk.f32.vlgmr.msra.gmra.mrb[6].mxu0 %vm1018_vm9, %v1185_v47 }
 0x7a7   : > { %3067 = vmatpush3.xpose.msk.msra.mxu0 %vm1018_vm9, %v1354_v45  ;;  %3068 = vmatprep.mubr.msk.f32.mxu0 %vm3403_vm0, %v3404_v1 }
 0x7a8   : > { %3076 = vmatprep.subr.mxu0 %v3404_v1  ;;  %v2189_v59 = vpop.permute.xlu1 %2188 }
 0x7aa   : > { %3069 = vmatmul.mubr.msk.f32.vlgmr.msra.gmra.mrb[8].mxu0 %vm1018_vm9, %v1352_v49 }
 0x7ab   : > { %3077 = vmatpush3.xpose.msk.msra.mxu0 %vm1018_vm9, %v1521_v51  ;;  %3078 = vmatprep.mubr.msk.f32.mxu0 %vm3403_vm0, %v3404_v1 }
 0x7ac   : > { %3086 = vmatprep.subr.mxu0 %v3404_v1 }
 0x7ae   : > { %3079 = vmatmul.mubr.msk.f32.vlgmr.msra.gmra.mrb[10].mxu0 %vm1018_vm9, %v1519_v52 }
 0x7af   : > { %3087 = vmatpush3.xpose.msk.msra.mxu0 %vm1018_vm9, %v1688_v53  ;;  %3088 = vmatprep.mubr.msk.f32.mxu0 %vm3403_vm0, %v3404_v1 }
 0x7b0   : > { %3096 = vmatprep.subr.mxu0 %v3404_v1 }
 0x7b2   : > { %3089 = vmatmul.mubr.msk.f32.vlgmr.msra.gmra.mrb[12].mxu0 %vm1018_vm9, %v1686_v54 }
 0x7b3   : > { %3097 = vmatpush3.xpose.msk.msra.mxu0 %vm1018_vm9, %v1855_v55  ;;  %3098 = vmatprep.mubr.msk.f32.mxu0 %vm3403_vm0, %v3404_v1 }
 0x7b4   : > { %3106 = vmatprep.subr.mxu0 %v3404_v1 }
 0x7b6   : > { %3099 = vmatmul.mubr.msk.f32.vlgmr.msra.gmra.mrb[14].mxu0 %vm1018_vm9, %v1853_v56 }
 0x7b7   : > { %3107 = vmatpush3.xpose.msk.msra.mxu0 %vm1018_vm9, %v2022_v57  ;;  %3108 = vmatprep.mubr.msk.f32.mxu0 %vm3403_vm0, %v3404_v1 }
 0x7b8   : > { %3116 = vmatprep.subr.mxu0 %v3404_v1 }
 0x7ba   : > { %3109 = vmatmul.mubr.msk.f32.vlgmr.msra.gmra.mrb[16].mxu0 %vm1018_vm9, %v2020_v58 }
 0x7bb   : > { %3117 = vmatpush3.xpose.msk.msra.mxu0 %vm1018_vm9, %v2189_v59  ;;  %3118 = vmatprep.mubr.msk.f32.mxu0 %vm3403_vm0, %v3404_v1 }
 0x7bc   : > { %3265 = vmatprep.subr.bf16.mxu0 %v3402_v0 }
 0x7be   : > { %3119 = vmatmul.mubr.msk.f32.vlgmr.msra.gmra.mrb[18].mxu0 %vm1018_vm9, %v2187_v60 }
 0x7bf   : > { %3142 = vmatprep.mubr.msk.f32.mxu0 %vm3403_vm0, %v3404_v1 }
 0x875   : > { %v3726_v61 = vpop.f32.mrb[4].mxu0 }
 0x876   : > { %v3055_v62 = vpop.f32.mrb[5].mxu0 }
 0x879   : > { %v1258_v63 = vpop.f32.mrb[6].mxu0 }
 0x87a   : > { %v1262_v2 = vmul.f32 0.125, %v1258_v63  ;;  %v3060_v3 = vpop.f32.mrb[7].mxu0 }
 0x87c   : > { %v1263_v4 = vsel %vm1094_vm11, %v1262_v2, -inf }
 0x87d   : > { %1264 = vmax.xlane.f32.xlu1 %v1263_v4  ;;  %v1425_v5 = vpop.f32.mrb[8].mxu0 }
 0x87e   : > { %v1429_v6 = vmul.f32 0.125, %v1425_v5  ;;  %v3070_v7 = vpop.f32.mrb[9].mxu0 }
 0x880   : > { %v1430_v8 = vsel %vm1094_vm11, %v1429_v6, -inf }
 0x881   : > { %1431 = vmax.xlane.f32.xlu0 %v1430_v8  ;;  %v1592_v9 = vpop.f32.mrb[10].mxu0 }
 0x882   : > { %v1596_v10 = vmul.f32 0.125, %v1592_v9  ;;  %v3080_v11 = vpop.f32.mrb[11].mxu0 }
 0x884   : > { %v1597_v12 = vsel %vm1094_vm11, %v1596_v10, -inf }
 0x885   : > { %1598 = vmax.xlane.f32.xlu0 %v1597_v12  ;;  %v1759_v13 = vpop.f32.mrb[12].mxu0 }
 0x886   : > { %v1763_v14 = vmul.f32 0.125, %v1759_v13  ;;  %v3090_v15 = vpop.f32.mrb[13].mxu0 }
 0x888   : > { %v1764_v16 = vsel %vm1094_vm11, %v1763_v14, -inf }
 0x889   : > { %1765 = vmax.xlane.f32.xlu0 %v1764_v16  ;;  %v1926_v17 = vpop.f32.mrb[14].mxu0 }
 0x88a   : > { %v1930_v18 = vmul.f32 0.125, %v1926_v17  ;;  %v3100_v19 = vpop.f32.mrb[15].mxu0 }
 0x88c   : > { %v1931_v20 = vsel %vm1094_vm11, %v1930_v18, -inf }
 0x88d   : > { %1932 = vmax.xlane.f32.xlu1 %v1931_v20  ;;  %v2093_v21 = vpop.f32.mrb[16].mxu0 }
 0x88e   : > { %v2097_v22 = vmul.f32 0.125, %v2093_v21  ;;  %v3110_v25 = vpop.f32.mrb[17].mxu0 }
 0x890   : > { %v2098_v26 = vsel %vm1094_vm11, %v2097_v22, -inf }
 0x891   : > { %2099 = vmax.xlane.f32.xlu0 %v2098_v26  ;;  %v2260_v27 = vpop.f32.mrb[18].mxu0 }
 0x892   : > { %v3120_v28 = vpop.f32.mrb[19].mxu0  ;;  %v2264_v29 = vmul.f32 0.125, %v2260_v27 }
 0x894   : > { %v2265_v30 = vsel %vm1094_vm11, %v2264_v29, -inf }
 0x89e   : > { %1274 = vrot.lane.b32.xlu1 %v3671_v33, %s3407_s3 }
 0x8c2   : > { %2266 = vmax.xlane.f32.xlu1 %v2265_v30 }
 0x8d3   : > { %1608 = vrot.lane.b32.xlu1 %v3671_v33, %s3409_s28 }
 0x8d7   : > { %1775 = vrot.lane.b32.xlu1 %v3671_v33, %s3410_s29 }
 0x90a   : > { %v1265_v31 = vpop.xlane.xlu1 %1264 }
 0x90b   : > { %v1266_v32 = vsub.f32 %v1262_v2, %v1265_v31 }
 0x90d   : > { %v1267_v34 = vmul.f32 1.442695, %v1266_v32 }
 0x90e   : > { %v1432_v35 = vpop.xlane.xlu0 %1431 }
 0x90f   : > { %3362 = vpow2.f32 %v1267_v34  ;;  %v1433_v36 = vsub.f32 %v1429_v6, %v1432_v35 }
 0x911   : > { %v1434_v37 = vmul.f32 1.442695, %v1433_v36 }
 0x912   : > { %v1599_v45 = vpop.xlane.xlu0 %1598 }
 0x913   : > { %3364 = vpow2.f32 %v1434_v37  ;;  %v1600_v46 = vsub.f32 %v1596_v10, %v1599_v45  ;;  %v2396_v45 = vld [vmem:[%s3989_s9 + $0x10] sm:$0xff] }
 0x915   : > { %v1601_v49 = vmul.f32 1.442695, %v1600_v46  ;;  %v2397_v46 = vld [vmem:[%s3989_s9 + $0x18] sm:$0xff] }
 0x916   : > { %v1766_v47 = vpop.xlane.xlu0 %1765 }
 0x917   : > { %v1767_v48 = vsub.f32 %v1763_v14, %v1766_v47  ;;  %3366 = vpow2.f32 %v1601_v49  ;;  %v3269_v47 = vpack.c.bf16 %v2397_v46, %v2396_v45  ;;  %v2399_v49 = vld [vmem:[%s3989_s9 + $0x28] sm:$0xff]  ;;  %v2608_v45 = vld [vmem:[%s3995_s15 + $0x18] sm:$0xff] }
 0x919   : > { %v3363_v38 = vpop.eup %3362  ;;  %v1768_v52 = vmul.f32 1.442695, %v1767_v48  ;;  %v2398_v48 = vld [vmem:[%s3989_s9 + $0x20] sm:$0xff] }
 0x91a   : > { %v1933_v39 = vpop.xlane.xlu1 %1932  ;;  %v1269_v40 = vsel %vm1094_vm11, %v3363_v38, 0.0 }
 0x91b   : > { %1270 = vadd.xlane.f32.xlu0 %v1269_v40  ;;  %v1934_v50 = vsub.f32 %v1930_v18, %v1933_v39  ;;  %3368 = vpow2.f32 %v1768_v52 }
 0x91d   : > { %v3365_v41 = vpop.eup %3364  ;;  %v1935_v53 = vmul.f32 1.442695, %v1934_v50  ;;  %v3272_v50 = vpack.c.bf16 %v2399_v49, %v2398_v48  ;;  %v2610_v48 = vld [vmem:[%s3995_s15 + $0x28] sm:$0xff] }
 0x91e   : > { %v1275_v42 = vpop.permute.xlu1 %1274  ;;  %v1436_v43 = vsel %vm1094_vm11, %v3365_v41, 0.0  ;;  %v2100_v51 = vpop.xlane.xlu0 %2099 }
 0x91f   : > { %3062 = vmatpush3.msk.msra.mxu1 %vm1110_vm10, %v1275_v42  ;;  %1437 = vadd.xlane.f32.xlu1 %v1436_v43  ;;  %v2101_v54 = vsub.f32 %v2097_v22, %v2100_v51  ;;  %3370 = vpow2.f32 %v1935_v53  ;;  %v2395_v42 = vld [vmem:[%s3989_s9 + $0x8] sm:$0xff]  ;;  %v2400_v53 = vld [vmem:[%s3989_s9 + $0x30] sm:$0xff] }
 0x920   : > { %3071 = vmatprep.subr.mxu1 %v3404_v1 }
 0x921   : > { %v2102_v55 = vmul.f32 1.442695, %v2101_v54  ;;  %v3367_v56 = vpop.eup %3366  ;;  %v2401_v54 = vld [vmem:[%s3989_s9 + $0x38] sm:$0xff] }
 0x922   : > { %v1603_v59 = vsel %vm1094_vm11, %v3367_v56, 0.0 }
 0x923   : > { %3372 = vpow2.f32 %v2102_v55  ;;  %v3275_v55 = vpack.c.bf16 %v2401_v54, %v2400_v53  ;;  %v2895_v54 = vld [vmem:[%s3991_s11] ss:$0 sm:$0xff] }
 0x925   : > { %v3369_v57 = vpop.eup %3368 }
 0x926   : > { %v1770_v3 = vsel %vm1094_vm11, %v3369_v57, 0.0 }
 0x929   : > { %v3371_v60 = vpop.eup %3370 }
 0x92a   : > { %v1937_v2 = vsel %vm1094_vm11, %v3371_v60, 0.0 }
 0x92d   : > { %v3373_v4 = vpop.eup %3372 }
 0x92e   : > { %v2104_v5 = vsel %vm1094_vm11, %v3373_v4, 0.0 }
 0x930   : > { %1942 = vrot.lane.b32.xlu1 %v3671_v33, %s3411_s20 }
 0x931   : > { %1441 = vrot.lane.b32.xlu0 %v3671_v33, %s3408_s26  ;;  %s2846_s26 = sshll.u32 %s4014_s30, 3 }
 0x932   : > { %s600_s20 = scalar_lea.vmem %s3999_s19, %s2846_s26 }
 0x94f   : > { %v2267_v58 = vpop.xlane.xlu1 %2266 }
 0x950   : > { %v2268_v62 = vsub.f32 %v2264_v29, %v2267_v58  ;;  %1604 = vadd.xlane.f32.xlu0 %v1603_v59 }
 0x952   : > { %v2269_v63 = vmul.f32 1.442695, %v2268_v62 }
 0x953   : > { %v1609_v8 = vpop.permute.xlu1 %1608 }
 0x954   : > { %3374 = vpow2.f32 %v2269_v63  ;;  %1938 = vadd.xlane.f32.xlu0 %v1937_v2  ;;  %1771 = vadd.xlane.f32.xlu1 %v1770_v3 }
 0x957   : > { %v1776_v9 = vpop.permute.xlu1 %1775 }
 0x958   : > { %2105 = vadd.xlane.f32.xlu1 %v2104_v5 }
 0x95e   : > { %v3375_v6 = vpop.eup %3374 }
 0x95f   : > { %v2271_v7 = vsel %vm1094_vm11, %v3375_v6, 0.0 }
 0x960   : > { %2272 = vadd.xlane.f32.xlu0 %v2271_v7 }
 0x969   : > { %2276 = vrot.lane.b32.xlu1 %v3671_v33, %s3413_s1 }
 0x976   : > { %2109 = vrot.lane.b32.xlu0 %v3671_v33, %s3412_s21 }
 0x9a8   : > { %v1271_v10 = vpop.xlane.xlu0 %1270 }
 0x9a9   : > { %3376 = vrcp.f32 %v1271_v10 }
 0x9ac   : > { %v1438_v11 = vpop.xlane.xlu1 %1437  ;;  %v1442_v14 = vpop.permute.xlu0 %1441 }
 0x9ad   : > { %3378 = vrcp.f32 %v1438_v11 }
 0x9b0   : > { %v1943_v33 = vpop.permute.xlu1 %1942 }
 0x9b3   : > { %v3377_v12 = vpop.eup %3376 }
 0x9b4   : > { %v1273_v13 = vmul.f32 %v3377_v12, %v3363_v38 }
 0x9b6   : > { %3064 = vmatmul.mubr.msk.f32.vlgmr.msra.gmra.mrb[8].mxu1 %vm1106_vm12, %v1273_v13 }
 0x9b7   : > { %v3379_v15 = vpop.eup %3378  ;;  %3072 = vmatpush3.msk.msra.mxu1 %vm1110_vm10, %v1442_v14  ;;  %3073 = vmatprep.mubr.msk.f32.mxu1 %vm3403_vm0, %v3404_v1 }
 0x9b8   : > { %v1440_v16 = vmul.f32 %v3379_v15, %v3365_v41  ;;  %3081 = vmatprep.subr.mxu1 %v3404_v1  ;;  %v2394_v41 = vld [vmem:[%s3989_s9] sm:$0xff] }
 0x9b9   : > { %v3266_v43 = vpack.c.bf16 %v2395_v42, %v2394_v41  ;;  %v2606_v41 = vld [vmem:[%s3995_s15 + $0x8] sm:$0xff]  ;;  %v2607_v42 = vld [vmem:[%s3995_s15 + $0x10] sm:$0xff] }
 0x9ba   : > { %3074 = vmatmul.mubr.msk.f32.vlgmr.msra.gmra.mrb[10].mxu1 %vm1106_vm12, %v1440_v16  ;;  %v3293_v46 = vpack.c.bf16 %v2608_v45, %v2607_v42 }
 0x9bb   : > { %3082 = vmatpush3.msk.msra.mxu1 %vm1110_vm10, %v1609_v8  ;;  %3083 = vmatprep.mubr.msk.f32.mxu1 %vm3403_vm0, %v3404_v1 }
 0x9bc   : > { %3091 = vmatprep.subr.mxu1 %v3404_v1  ;;  %3267 = vmatpush3.bf16.msra.mxu0 %v3266_v43 }
 0x9bd   : > { %3268 = vmatprep.subr.bf16.mxu0 %v3402_v0 }
 0x9c0   : > { %3270 = vmatpush3.bf16.msra.mxu0 %v3269_v47  ;;  %v2609_v47 = vld [vmem:[%s3995_s15 + $0x20] sm:$0xff] }
 0x9c1   : > { %3271 = vmatprep.subr.bf16.mxu0 %v3402_v0  ;;  %v3296_v49 = vpack.c.bf16 %v2610_v48, %v2609_v47 }
 0x9c4   : > { %3273 = vmatpush3.bf16.msra.mxu0 %v3272_v50 }
 0x9c5   : > { %3274 = vmatprep.subr.bf16.mxu0 %v3402_v0 }
 0x9c8   : > { %3276 = vmatpush3.bf16.msra.mxu0 %v3275_v55 }
 0x9c9   : > { %3289 = vmatprep.subr.bf16.mxu0 %v3402_v0 }
 0x9dd   : > { %v1605_v17 = vpop.xlane.xlu0 %1604 }
 0x9de   : > { %3380 = vrcp.f32 %v1605_v17 }
 0x9e1   : > { %v1772_v18 = vpop.xlane.xlu1 %1771  ;;  %v1939_v19 = vpop.xlane.xlu0 %1938 }
 0x9e2   : > { %3382 = vrcp.f32 %v1772_v18 }
 0x9e3   : > { %3384 = vrcp.f32 %v1939_v19 }
 0x9e5   : > { %v2106_v20 = vpop.xlane.xlu1 %2105 }
 0x9e6   : > { %3386 = vrcp.f32 %v2106_v20 }
 0x9e8   : > { %v3381_v21 = vpop.eup %3380 }
 0x9e9   : > { %v1607_v22 = vmul.f32 %v3381_v21, %v3367_v56  ;;  %v2277_v35 = vpop.permute.xlu1 %2276 }
 0x9eb   : > { %3084 = vmatmul.mubr.msk.f32.vlgmr.msra.gmra.mrb[12].mxu1 %vm1106_vm12, %v1607_v22 }
 0x9ec   : > { %3092 = vmatpush3.msk.msra.mxu1 %vm1110_vm10, %v1776_v9  ;;  %3093 = vmatprep.mubr.msk.f32.mxu1 %vm3403_vm0, %v3404_v1  ;;  %v3383_v25 = vpop.eup %3382 }
 0x9ed   : > { %v2273_v26 = vpop.xlane.xlu0 %2272  ;;  %3101 = vmatprep.subr.mxu1 %v3404_v1  ;;  %v1774_v27 = vmul.f32 %v3383_v25, %v3369_v57  ;;  %v3385_v28 = vpop.eup %3384 }
 0x9ee   : > { %3388 = vrcp.f32 %v2273_v26  ;;  %v1941_v29 = vmul.f32 %v3385_v28, %v3371_v60  ;;  %v2512_v28 = vld [vmem:[%s3993_s13] sm:$0xff] }
 0x9ef   : > { %3094 = vmatmul.mubr.msk.f32.vlgmr.msra.gmra.mrb[14].mxu1 %vm1106_vm12, %v1774_v27 }
 0x9f0   : > { %3102 = vmatpush3.msk.msra.mxu1 %vm1110_vm10, %v1943_v33  ;;  %3103 = vmatprep.mubr.msk.f32.mxu1 %vm3403_vm0, %v3404_v1  ;;  %v3387_v31 = vpop.eup %3386 }
 0x9f1   : > { %v2110_v30 = vpop.permute.xlu0 %2109  ;;  %3111 = vmatprep.subr.mxu1 %v3404_v1  ;;  %v2108_v32 = vmul.f32 %v3387_v31, %v3373_v4  ;;  %v2515_v31 = vld [vmem:[%s3993_s13 + $0x18] sm:$0xff] }
 0x9f3   : > { %3104 = vmatmul.mubr.msk.f32.vlgmr.msra.gmra.mrb[16].mxu1 %vm1106_vm12, %v1941_v29 }
 0x9f4   : > { %3112 = vmatpush3.msk.msra.mxu1 %vm1110_vm10, %v2110_v30  ;;  %3113 = vmatprep.mubr.msk.f32.mxu1 %vm3403_vm0, %v3404_v1  ;;  %v2514_v30 = vld [vmem:[%s3993_s13 + $0x10] sm:$0xff] }
 0x9f5   : > { %3121 = vmatprep.subr.mxu1 %v3404_v1 }
 0x9f7   : > { %3114 = vmatmul.mubr.msk.f32.vlgmr.msra.gmra.mrb[18].mxu1 %vm1106_vm12, %v2108_v32  ;;  %v3281_v32 = vpack.c.bf16 %v2515_v31, %v2514_v30  ;;  %v2705_v30 = vld [vmem:[%s3997_s17 + $0x30] sm:$0xff] }
 0x9f8   : > { %v3389_v34 = vpop.eup %3388  ;;  %3122 = vmatpush3.msk.msra.mxu1 %vm1110_vm10, %v2277_v35  ;;  %3123 = vmatprep.mubr.msk.f32.mxu1 %vm3403_vm0, %v3404_v1  ;;  %v2517_v35 = vld [vmem:[%s3993_s13 + $0x28] sm:$0xff] }
 0x9f9   : > { %v2275_v36 = vmul.f32 %v3389_v34, %v3375_v6  ;;  %3277 = vmatprep.subr.bf16.mxu1 %v3402_v0  ;;  %v2516_v34 = vld [vmem:[%s3993_s13 + $0x20] sm:$0xff] }
 0x9fb   : > { %3124 = vmatmul.mubr.msk.f32.vlgmr.msra.gmra.mrb[20].mxu1 %vm1106_vm12, %v2275_v36  ;;  %v3284_v36 = vpack.c.bf16 %v2517_v35, %v2516_v34 }
 0x9fc   : > { %3161 = vmatprep.mubr.msk.f32.mxu1 %vm3403_vm0, %v3404_v1 }
 0xa89   : > { %v1347_v37 = vpop.f32.mrb[8].mxu1 }
 0xa8a   : > { %v3065_v38 = vpop.f32.mrb[9].mxu1  ;;  %2354 = vrot.lane.b32.xlu0 %v1347_v37, %s3420_s2  ;;  %s4012_s2 = smov 56   ;;  %v2518_v37 = vld [vmem:[%s3993_s13 + $0x30] sm:$0xff] }
 0xa8b   : > { %v2519_v38 = vld [vmem:[%s3993_s13 + $0x38] sm:$0xff] }
 0xa8d   : > { %v1514_v39 = vpop.f32.mrb[10].mxu1 }
 0xa8e   : > { %2358 = vrot.lane.b32.xlu1 %v1514_v39, %s3419_s22  ;;  %v3075_v40 = vpop.f32.mrb[11].mxu1  ;;  %v3287_v39 = vpack.c.bf16 %v2519_v38, %v2518_v37  ;;  %v2707_v38 = vld [vmem:[%s3998_s18] sm:$0x1] }
 0xa8f   : > { %v2605_v40 = vld [vmem:[%s3995_s15] sm:$0xff] }
 0xa90   : > { %v3290_v43 = vpack.c.bf16 %v2606_v41, %v2605_v40 }
 0xabe   : > { %v1681_v51 = vpop.f32.mrb[12].mxu1 }
 0xabf   : > { %2362 = vrot.lane.b32.xlu0 %v1681_v51, %s3418_s25  ;;  %v3085_v52 = vpop.f32.mrb[13].mxu1  ;;  %s4011_s25 = smov 48  }
 0xac2   : > { %v1848_v56 = vpop.f32.mrb[14].mxu1 }
 0xac3   : > { %2366 = vrot.lane.b32.xlu1 %v1848_v56, %s3417_s24  ;;  %v3095_v57 = vpop.f32.mrb[15].mxu1  ;;  %v2896_v56 = vld [vmem:[%s3992_s12] ss:$0 sm:$0xff] }
 0xac6   : > { %v2015_v58 = vpop.f32.mrb[16].mxu1 }
 0xac7   : > { %2370 = vrot.lane.b32.xlu0 %v2015_v58, %s3416_s23  ;;  %v3105_v59 = vpop.f32.mrb[17].mxu1 }
 0xac8   : > { %v2611_v59 = vld [vmem:[%s3995_s15 + $0x30] sm:$0xff] }
 0xaca   : > { %v2182_v60 = vpop.f32.mrb[18].mxu1 }
 0xacb   : > { %2374 = vrot.lane.b32.xlu1 %v2182_v60, %s4011_s25  ;;  %v3115_v62 = vpop.f32.mrb[19].mxu1  ;;  %v2612_v60 = vld [vmem:[%s3995_s15 + $0x38] sm:$0xff] }
 0xacc   : > { %v3299_v62 = vpack.c.bf16 %v2612_v60, %v2611_v59 }
 0xace   : > { %v2349_v63 = vpop.f32.mrb[20].mxu1 }
 0xacf   : > { %2378 = vrot.lane.b32.xlu0 %v2349_v63, %s4012_s2  ;;  %v3125_v2 = vpop.f32.mrb[21].mxu1  ;;  %v2613_v63 = vld [vmem:[%s3995_s15 + $0x40] sm:$0xff] }
 0xafc   : > { %v2355_v3 = vpop.permute.xlu0 %2354 }
 0xafd   : > { %v2381_v7 = vsel %vm1018_vm9, %v3726_v61, %v2355_v3  ;;  %v2893_v61 = vld [vmem:[%s3990_s10] ss:$0 sm:$0xff]  ;;  %v2615_v3 = vld [vmem:[%s3995_s15 + $0x50] sm:$0xff] }
 0xb00   : > { %v2359_v4 = vpop.permute.xlu1 %2358 }
 0xb01   : > { %v2383_v8 = vsel %vm2382_vm13, %v2381_v7, %v2359_v4  ;;  %v2616_v4 = vld [vmem:[%s3995_s15 + $0x58] sm:$0xff]  ;;  %v2618_v7 = vld [vmem:[%s3995_s15 + $0x68] sm:$0xff] }
 0xb31   : > { %v2363_v5 = vpop.permute.xlu0 %2362 }
 0xb32   : > { %v2385_v10 = vsel %vm2384_vm14, %v2383_v8, %v2363_v5  ;;  %v3305_v5 = vpack.c.bf16 %v2616_v4, %v2615_v3 }
 0xb35   : > { %v2367_v6 = vpop.permute.xlu1 %2366 }
 0xb36   : > { %v2387_v12 = vsel %vm2386_vm15, %v2385_v10, %v2367_v6  ;;  %v2617_v6 = vld [vmem:[%s3995_s15 + $0x60] sm:$0xff]  ;;  %v2620_v10 = vld [vmem:[%s3995_s15 + $0x78] sm:$0xff] }
 0xb37   : > { %v3308_v8 = vpack.c.bf16 %v2618_v7, %v2617_v6 }
 0xb39   : > { %v2371_v9 = vpop.permute.xlu0 %2370 }
 0xb3a   : > { %v2389_v13 = vsel %vm2388_vm2, %v2387_v12, %v2371_v9  ;;  %v2619_v9 = vld [vmem:[%s3995_s15 + $0x70] sm:$0xff]  ;;  %v2699_v12 = vld [vmem:[%s3997_s17] sm:$0xff] }
 0xb3d   : > { %v2375_v11 = vpop.permute.xlu1 %2374 }
 0xb3e   : > { %v2391_v14 = vsel %vm2390_vm3, %v2389_v13, %v2375_v11  ;;  %v3311_v11 = vpack.c.bf16 %v2620_v10, %v2619_v9  ;;  %v2700_v13 = vld [vmem:[%s3997_s17 + $0x8] sm:$0xff] }
 0xb41   : > { %v2379_v15 = vpop.permute.xlu0 %2378 }
 0xb42   : > { %v2393_v16 = vsel %vm2392_vm4, %v2391_v14, %v2379_v15  ;;  %v2701_v14 = vld [vmem:[%s3997_s17 + $0x10] sm:$0xff]  ;;  %v3314_v15 = vpack.c.bf16 %v2700_v13, %v2699_v12 }
 0xb43   : > { %3143 = vmatmul.mubr.msk.f32.vlgmr.msra.gmra.mrb[20].mxu0 %vm606_vm1, %v2393_v16  ;;  %v2702_v16 = vld [vmem:[%s3997_s17 + $0x18] sm:$0xff] }
 0xb44   : > { %3196 = vmatprep.mubr.msk.f32.mxu0 %vm3403_vm0, %v3404_v1  ;;  %3291 = vmatpush3.bf16.msra.mxu0 %v3290_v43 }
 0xb45   : > { %3292 = vmatprep.subr.bf16.mxu0 %v3402_v0 }
 0xb48   : > { %3294 = vmatpush3.bf16.msra.mxu0 %v3293_v46 }
 0xb49   : > { %3295 = vmatprep.subr.bf16.mxu0 %v3402_v0 }
 0xb4c   : > { %3297 = vmatpush3.bf16.msra.mxu0 %v3296_v49 }
 0xb4d   : > { %3298 = vmatprep.subr.bf16.mxu0 %v3402_v0 }
 0xb50   : > { %3300 = vmatpush3.bf16.msra.mxu0 %v3299_v62 }
 0xb51   : > { %3301 = vmatprep.subr.bf16.mxu0 %v3402_v0 }
 0xc16   : > { %v2478_v33 = vpop.f32.mrb[20].mxu0 }
 0xc17   : > { %v2479_v17 = vadd.f32 %v2893_v61, %v2478_v33  ;;  %v3144_v18 = vpop.f32.mrb[21].mxu0  ;;  %v3317_v61 = vpack.c.bf16 %v2702_v16, %v2701_v14  ;;  %v2703_v33 = vld [vmem:[%s3997_s17 + $0x20] sm:$0xff] }
 0xc19   : > { %v3835_v19 = vadd.f32 %v2479_v17, %v3589_v44  ;;  %v2513_v44 = vld [vmem:[%s3993_s13 + $0x8] sm:$0xff] }
 0xc1a   : > { %v3278_v29 = vpack.c.bf16 %v2513_v44, %v2512_v28  ;;  %v2704_v17 = vld [vmem:[%s3997_s17 + $0x28] sm:$0xff] }
 0xc1b   : > { %v2485_v20 = vsel %vm884_vm8, %v3835_v19, 0.0  ;;  %v3320_v18 = vpack.c.bf16 %v2704_v17, %v2703_v33 }
 0xc1c   : > { %2486 = vadd.xlane.f32.xlu1 %v2485_v20  ;;  %3279 = vmatpush3.bf16.msra.mxu1 %v3278_v29  ;;  %v2897_v20 = vld [vmem:[%s3994_s14] ss:$0 sm:$0xff] }
 0xc1d   : > { %3280 = vmatprep.subr.bf16.mxu1 %v3402_v0 }
 0xc20   : > { %3282 = vmatpush3.bf16.msra.mxu1 %v3281_v32  ;;  %v2899_v32 = vld [vmem:[%s3996_s16] ss:$0 sm:$0xff] }
 0xc21   : > { %3283 = vmatprep.subr.bf16.mxu1 %v3402_v0 }
 0xc24   : > { %3285 = vmatpush3.bf16.msra.mxu1 %v3284_v36 }
 0xc25   : > { %3286 = vmatprep.subr.bf16.mxu1 %v3402_v0 }
 0xc28   : > { %3288 = vmatpush3.bf16.msra.mxu1 %v3287_v39 }
 0xc29   : > { %3313 = vmatprep.subr.bf16.mxu1 %v3402_v0 }
 0xca9   : > { %v2487_v21 = vpop.xlane.xlu1 %2486 }
 0xcaa   : > { %v2488_v22 = vmul.f32 0.015625, %v2487_v21 }
 0xcac   : > { %v2489_v25 = vsub.f32 %v3835_v19, %v2488_v22 }
 0xcae   : > { %v2490_v26 = vmul.f32 %v2489_v25, %v2489_v25 }
 0xcb0   : > { %v2491_v27 = vsel %vm884_vm8, %v2490_v26, 0.0 }
 0xcb1   : > { %2492 = vadd.xlane.f32.xlu0 %v2491_v27 }
 0xd3e   : > { %v2493_v50 = vpop.xlane.xlu0 %2492 }
 0xd3f   : > { %v2494_v51 = vmul.f32 0.015625, %v2493_v50 }
 0xd41   : > { %v2495_v52 = vadd.f32 1e-05, %v2494_v51 }
 0xd43   : > { %3390 = vrsqrt.f32 %v2495_v52 }
 0xd4d   : > { %v3391_v53 = vpop.eup %3390 }
 0xd4e   : > { %v2497_v55 = vmul.f32 %v3391_v53, %v2489_v25 }
 0xd50   : > { %v2504_v57 = vmul.f32 %v2895_v54, %v2497_v55 }
 0xd52   : > { %v2511_v58 = vadd.f32 %v2896_v56, %v2504_v57 }
 0xd54   : > { %3162 = vmatmul.mubr.msk.f32.vlgmr.msra.gmra.mrb[22].mxu1 %vm606_vm1, %v2511_v58 }
 0xd55   : > { %3215 = vmatprep.mubr.msk.f32.mxu1 %vm3403_vm0, %v3404_v1  ;;  %v2614_v1 = vld [vmem:[%s3995_s15 + $0x48] sm:$0xff]  ;;  %3315 = vmatpush3.bf16.msra.mxu1 %v3314_v15 }
 0xd56   : > { %v3302_v2 = vpack.c.bf16 %v2614_v1, %v2613_v63  ;;  %3316 = vmatprep.subr.bf16.mxu1 %v3402_v0 }
 0xd58   : > { %3303 = vmatpush3.bf16.msra.mxu0 %v3302_v2 }
 0xd59   : > { %3304 = vmatprep.subr.bf16.mxu0 %v3402_v0  ;;  %3318 = vmatpush3.bf16.msra.mxu1 %v3317_v61 }
 0xd5a   : > { %3319 = vmatprep.subr.bf16.mxu1 %v3402_v0 }
 0xd5c   : > { %3306 = vmatpush3.bf16.msra.mxu0 %v3305_v5 }
 0xd5d   : > { %3307 = vmatprep.subr.bf16.mxu0 %v3402_v0  ;;  %3321 = vmatpush3.bf16.msra.mxu1 %v3320_v18 }
 0xd5e   : > { %3322 = vmatprep.subr.bf16.mxu1 %v3402_v0 }
 0xd60   : > { %3309 = vmatpush3.bf16.msra.mxu0 %v3308_v8 }
 0xd61   : > { %3310 = vmatprep.subr.bf16.mxu0 %v3402_v0  ;;  %v2706_v0 = vld [vmem:[%s3997_s17 + $0x38] sm:$0xff] }
 0xd62   : > { %v3323_v31 = vpack.c.bf16 %v2706_v0, %v2705_v30 }
 0xd64   : > { %3312 = vmatpush3.bf16.msra.mxu0 %v3311_v11  ;;  %3324 = vmatpush3.bf16.msra.mxu1 %v3323_v31 }
 0xe27   : > { %v2596_v21 = vpop.f32.mrb[22].mxu1 }
 0xe28   : > { %v2597_v22 = vadd.f32 %v2897_v20, %v2596_v21  ;;  %v3163_v25 = vpop.f32.mrb[23].mxu1 }
 0xe2a   : > { %v2601_v26 = vmul.f32 0.70710677, %v2597_v22  ;;  %v2600_v28 = vmul.f32 0.5, %v2597_v22 }
 0xe2c   : > { %3392 = verf.f32 %v2601_v26 }
 0xe36   : > { %v3393_v27 = vpop.eup %3392 }
 0xe37   : > { %v2603_v44 = vadd.f32 1.0, %v3393_v27 }
 0xe39   : > { %v2604_v29 = vmul.f32 %v2603_v44, %v2600_v28 }
 0xe3b   : > { %3197 = vmatmul.mubr.f32.vlgmr.msra.gmra.mrb[22].mxu0 %v2604_v29 }
 0xf0e   : > { %v2694_v34 = vpop.f32.mrb[22].mxu0 }
 0xf0f   : > { %v2695_v35 = vadd.f32 %v2899_v32, %v2694_v34  ;;  %v3198_v36 = vpop.f32.mrb[23].mxu0 }
 0xf11   : > { %v2698_v37 = vadd.f32 %v2695_v35, %v3835_v19 }
 0xf13   : > { %3216 = vmatmul.mubr.msk.f32.vlgmr.msra.gmra.mrb[24].mxu1 %vm606_vm1, %v2698_v37 }
 0xfe6   : > { %v2777_v39 = vpop.f32.mrb[24].mxu1 }
 0xfe7   : > { %v2778_v40 = vadd.f32 %v2777_v39, %v2707_v38  ;;  %v3217_v41 = vpop.f32.mrb[25].mxu1 }
 0xfe9   : > { %v2784_v42 = vrot.slane %v2778_v40, %v933_v24 }
 0xfeb   : > { %2785 = vst [vmem:[%s600_s20] sm:$0xff] %v2784_v42 }
 0xfec PF: > { %s29_s0 = sadd.s32 1, %s3400_s0  }
 0xfed   : > { %p26_p4 = scmp.ge.s32.totalorder %s29_s0, 4  }
 0xfef   :  { %28 = sbr.rel (!%p26_p4) target bundleno = 5 (0x5), region = 126 }

</bundles_post_ra>
